<compile_context>
chip_gen: v7x
topology: tpu7x:2x2x1
jax: 0.10.0
libtpu: 0.0.40
codegen_flags: <defaults>
</compile_context>

<pallas_src>
import jax
import jax.numpy as jnp
from jax.experimental import pallas as pl
from jax.experimental.pallas import tpu as pltpu


def _round_up(a: int, b: int) -> int:
    return (a + b - 1) // b * b


def _cdiv(a: int, b: int) -> int:
    return (a + b - 1) // b


# ---------- fused Pallas kernel: conv(+bias) -> maxpool -> ReLU -> linear ----------

def fused_conv_pool_linear_kernel(x_ref, wt_ref, wl_ref, o_ref):
    """One grid step handles SP samples.

    x_ref : (SP, K1)        bf16  flattened zero-padded image per sample + a 1.0 bias lane
    wt_ref: (K1, ncand*CW)  bf16  Toeplitz conv weight; columns ordered (q, p, c) with
                                  q = pool-window candidate, p = pooled position,
                                  c = conv channel; row K1-1 carries the conv bias.
    wl_ref: (CW, P2pad)     bf16  linear weight, rows ordered (p, c), output lane-padded
    o_ref : (SP, P2pad)     f32   output block (lane-dense stores)
    """
    cw = wl_ref.shape[0]                  # npos * hid_c : pooled feature width
    ncand = wt_ref.shape[1] // cw         # stride**2 pool-window candidates

    x = x_ref[...]
    # Conv2d + bias for candidate q, all pooled positions/channels at once:
    # one (SP, K1) @ (K1, CW) MXU matmul per candidate (bf16 operands, f32 accumulate).
    pooled = jnp.dot(x, wt_ref[:, 0:cw], preferred_element_type=jnp.float32)
    for q in range(1, ncand):
        cand = jnp.dot(x, wt_ref[:, q * cw:(q + 1) * cw],
                       preferred_element_type=jnp.float32)
        pooled = jnp.maximum(pooled, cand)        # MaxPool2d over the candidates
    pooled = jnp.maximum(pooled, 0.0)             # ReLU (commutes with the max)

    # Linear (no bias): ONE lane-dense (SP, CW) @ (CW, P2pad) matmul, f32 accumulation.
    o_ref[...] = jnp.dot(pooled.astype(jnp.bfloat16), wl_ref[...],
                         preferred_element_type=jnp.float32)


# ---------------- wrapper ----------------

def conv_model_forward(x, conv_w, conv_b, lin_w, *, kernel_size=5, stride=2):
    """x: [B, P, C_in, H, W]; returns [B, P, pieces**2] (matches torch ConvModel)."""
    B, P, C_in, H, W = x.shape
    hid_c = conv_w.shape[0]
    P2 = lin_w.shape[0]
    k = kernel_size
    pad = k // 2
    assert H % stride == 0 and W % stride == 0
    H2, W2 = H // stride, W // stride
    npos = H2 * W2                         # pooled spatial positions per sample
    ncand = stride * stride                # pool-window candidates per position
    Hp, Wp = H + 2 * pad, W + 2 * pad
    Kin = C_in * Hp * Wp                   # padded-image pixels per sample
    K1 = Kin + 1                           # + a 1.0 lane that folds the conv bias in
    CW = npos * hid_c                      # pooled feature width (lane-dense)
    NC = ncand * CW                        # conv-matmul output columns
    P2pad = _round_up(P2, 128)             # lane-dense output stores
    assert lin_w.shape[1] == CW

    N = B * P
    # Samples per grid step: multiples of 16 keep bf16 blocks sublane-tile aligned;
    # cap 256 keeps per-step VMEM at a few MiB (fits every generation's default scoped
    # VMEM, including v5e's 16 MiB, so no vmem_limit override is needed); force >=2
    # grid steps when there's enough work so ("parallel",) uses both v7x TensorCores.
    SP_CAP = 256
    N16 = _round_up(N, 16)
    G = max(_cdiv(N16, SP_CAP), 2 if N16 >= 32 else 1)
    SP = _round_up(_cdiv(N16, G), 16)
    N_pad = G * SP

    # ---- per-sample kernel input: zero-padded image, flattened, plus a 1.0 bias lane.
    # Dominant HBM stream is now ~1x the raw input (no im2col blow-up, no K-pad zeros).
    xm = x.reshape(N, C_in, H, W)
    xp = jnp.pad(xm, ((0, 0), (0, 0), (pad, pad), (pad, pad))).reshape(N, Kin)
    xk = jnp.concatenate([xp, jnp.ones((N, 1), xp.dtype)], axis=1).astype(jnp.bfloat16)
    if N_pad > N:
        xk = jnp.pad(xk, ((0, N_pad - N), (0, 0)))

    # ---- conv weight as a Toeplitz/unfold matrix:
    #   Wt[(u, r, s), (q, p, c)] = conv_w[c, u, kh, kw]  where
    #   (r, s) = (stride*h2 + di + kh, stride*w2 + dj + kw); built via exact one-hot einsums.
    # TODO(synk): for much larger patch sizes / channel counts this matrix grows as
    # (C_in*Hp*Wp) x (ncand*npos*hid_c); switch to in-kernel im2col with manual DMA then.
    sh = (jnp.arange(Hp)[:, None, None] ==
          jnp.arange(H)[None, :, None] + jnp.arange(k)[None, None, :]).astype(jnp.float32)
    sw = (jnp.arange(Wp)[:, None, None] ==
          jnp.arange(W)[None, :, None] + jnp.arange(k)[None, None, :]).astype(jnp.float32)
    t = jnp.einsum('ria,sjb,ouab->ursijo', sh, sw, conv_w.astype(jnp.float32))
    t = t.reshape(C_in, Hp, Wp, H2, stride, W2, stride, hid_c)   # i -> (h2, di), j -> (w2, dj)
    t = t.transpose(0, 1, 2, 4, 6, 3, 5, 7).reshape(Kin, NC)     # columns ordered (q, p, c)
    bias_row = jnp.tile(conv_b.astype(jnp.float32), ncand * npos)[None, :]
    wt = jnp.concatenate([t, bias_row], axis=0).astype(jnp.bfloat16)        # (K1, NC)

    # ---- linear weight: torch flatten order (c, h2, w2) -> kernel feature order (p, c);
    # output dim lane-padded to 128, bf16 operands (f32 accumulation in-kernel).
    wl = lin_w.reshape(P2, hid_c, npos).transpose(2, 1, 0).reshape(CW, P2)
    wl = jnp.pad(wl, ((0, 0), (0, P2pad - P2))).astype(jnp.bfloat16)

    out_pad = pl.pallas_call(
        fused_conv_pool_linear_kernel,
        out_shape=jax.ShapeDtypeStruct((N_pad, P2pad), jnp.float32),
        grid_spec=pltpu.PrefetchScalarGridSpec(
            num_scalar_prefetch=0,
            grid=(G,),
            in_specs=[
                pl.BlockSpec((SP, K1), lambda g: (g, 0)),      # streamed per grid step
                pl.BlockSpec((K1, NC), lambda g: (0, 0)),      # resident conv weight
                pl.BlockSpec((CW, P2pad), lambda g: (0, 0)),   # resident linear weight
            ],
            out_specs=pl.BlockSpec((SP, P2pad), lambda g: (g, 0)),
        ),
        compiler_params=pltpu.CompilerParams(dimension_semantics=("parallel",)),
    )(xk, wt, wl)

    return out_pad[:N, :P2].reshape(B, P, P2)


# ---------------- reference (plain JAX) for sanity ----------------

def conv_model_reference(x, conv_w, conv_b, lin_w, *, kernel_size=5, stride=2):
    B, P, C_in, H, W = x.shape
    hid_c = conv_w.shape[0]
    N = B * P
    xm = x.reshape(N, C_in, H, W)
    conv = jax.lax.conv_general_dilated(
        xm, conv_w, window_strides=(1, 1),
        padding=[(kernel_size // 2,) * 2] * 2,
        dimension_numbers=("NCHW", "OIHW", "NCHW"),
        precision=jax.lax.Precision.HIGHEST)
    conv = jnp.maximum(conv + conv_b[None, :, None, None], 0.0)
    H2, W2 = H // stride, W // stride
    pooled = conv.reshape(N, hid_c, H2, stride, W2, stride).max(axis=(3, 5))
    flat = pooled.reshape(N, -1)                 # (c, h, w) flatten order, like torch
    out = jnp.dot(flat, lin_w.T, precision=jax.lax.Precision.HIGHEST)
    return out.reshape(B, P, lin_w.shape[0])


# ---------------- main ----------------

if __name__ == "__main__":
    # Module hyper-params (small, consistent with the forward pass):
    in_c, pieces, image_size, hid_c, stride, kernel_size = 3, 2, 16, 32, 2, 5
    patch_size = image_size // pieces                 # 8
    fm = patch_size // stride                         # 4
    flattened = hid_c * fm * fm                       # 512
    P2 = pieces ** 2                                  # 4
    B, P = 2, pieces ** 2                             # batch=2, 4 pieces per image

    key = jax.random.PRNGKey(0)
    k1, k2, k3 = jax.random.split(key, 3)

    # kaiming_normal_(mode='fan_out', nonlinearity='relu') analogue, deterministic
    conv_w = jax.random.normal(k1, (hid_c, in_c, kernel_size, kernel_size),
                               jnp.float32) * jnp.sqrt(2.0 / (hid_c * kernel_size ** 2))
    conv_b = jnp.zeros((hid_c,), jnp.float32)
    lin_w = jax.random.normal(k2, (P2, flattened), jnp.float32) * jnp.sqrt(2.0 / P2)

    x = jax.random.normal(k3, (B, P, in_c, patch_size, patch_size), jnp.float32)

    forward = jax.jit(lambda xx, cw, cb, lw: conv_model_forward(
        xx, cw, cb, lw, kernel_size=kernel_size, stride=stride))

    out = forward(x, conv_w, conv_b, lin_w)
    out = jax.block_until_ready(out)

    ref = conv_model_reference(x, conv_w, conv_b, lin_w,
                               kernel_size=kernel_size, stride=stride)
    assert out.shape == (B, P, P2)
    # bf16 MXU operands vs. HIGHEST-precision f32 reference -> loosened tolerance.
    assert jnp.allclose(out, ref, rtol=5e-2, atol=1e-1), float(jnp.max(jnp.abs(out - ref)))

    print("KERNEL_OK")
</pallas_src>

<mosaic_0001>
module attributes {stable_mosaic.version = 11 : i64} {
  func.func @fused_conv_pool_linear_kernel(%arg0: i32, %arg1: memref<16x433xbf16, #tpu.memory_space<vmem>>, %arg2: memref<433x2048xbf16, #tpu.memory_space<vmem>>, %arg3: memref<512x128xbf16, #tpu.memory_space<vmem>>, %arg4: memref<16x128xf32, #tpu.memory_space<vmem>>) attributes {dimension_semantics = [#tpu.dimension_semantics<parallel>], iteration_bounds = array<i64: 1>, scalar_prefetch = 0 : i64, scratch_operands = 0 : i64, tpu.core_type = #tpu.core_type<tc>, window_params = [{transform_indices = @transform_0, window_bounds = array<i64: 16, 433>}, {pipeline_mode = #tpu.pipeline_mode<synchronous>, transform_indices = @transform_1, window_bounds = array<i64: 433, 2048>}, {pipeline_mode = #tpu.pipeline_mode<synchronous>, transform_indices = @transform_2, window_bounds = array<i64: 512, 128>}, {transform_indices = @transform_3, window_bounds = array<i64: 16, 128>}]} {
    %c0 = arith.constant 0 : index
    %c0_0 = arith.constant 0 : index
    %0 = vector.load %arg1[%c0, %c0_0] : memref<16x433xbf16, #tpu.memory_space<vmem>>, vector<16x433xbf16>
    %c0_1 = arith.constant 0 : index
    %c0_2 = arith.constant 0 : index
    %1 = vector.load %arg2[%c0_1, %c0_2] : memref<433x2048xbf16, #tpu.memory_space<vmem>>, vector<433x512xbf16>
    %cst = arith.constant dense<0.000000e+00> : vector<16x512xf32>
    %2 = tpu.matmul %0, %1, %cst {dimension_numbers = #tpu.dot_dimension_numbers<[1], [0], [0], [1], [0, 0, 1, 1], [], []>} : vector<16x433xbf16>, vector<433x512xbf16>, vector<16x512xf32> -> vector<16x512xf32>
    %c0_3 = arith.constant 0 : index
    %c512 = arith.constant 512 : index
    %3 = vector.load %arg2[%c0_3, %c512] : memref<433x2048xbf16, #tpu.memory_space<vmem>>, vector<433x512xbf16>
    %cst_4 = arith.constant dense<0.000000e+00> : vector<16x512xf32>
    %4 = tpu.matmul %0, %3, %cst_4 {dimension_numbers = #tpu.dot_dimension_numbers<[1], [0], [0], [1], [0, 0, 1, 1], [], []>} : vector<16x433xbf16>, vector<433x512xbf16>, vector<16x512xf32> -> vector<16x512xf32>
    %5 = arith.maximumf %2, %4 : vector<16x512xf32>
    %c0_5 = arith.constant 0 : index
    %c1024 = arith.constant 1024 : index
    %6 = vector.load %arg2[%c0_5, %c1024] : memref<433x2048xbf16, #tpu.memory_space<vmem>>, vector<433x512xbf16>
    %cst_6 = arith.constant dense<0.000000e+00> : vector<16x512xf32>
    %7 = tpu.matmul %0, %6, %cst_6 {dimension_numbers = #tpu.dot_dimension_numbers<[1], [0], [0], [1], [0, 0, 1, 1], [], []>} : vector<16x433xbf16>, vector<433x512xbf16>, vector<16x512xf32> -> vector<16x512xf32>
    %8 = arith.maximumf %5, %7 : vector<16x512xf32>
    %c0_7 = arith.constant 0 : index
    %c1536 = arith.constant 1536 : index
    %9 = vector.load %arg2[%c0_7, %c1536] : memref<433x2048xbf16, #tpu.memory_space<vmem>>, vector<433x512xbf16>
    %cst_8 = arith.constant dense<0.000000e+00> : vector<16x512xf32>
    %10 = tpu.matmul %0, %9, %cst_8 {dimension_numbers = #tpu.dot_dimension_numbers<[1], [0], [0], [1], [0, 0, 1, 1], [], []>} : vector<16x433xbf16>, vector<433x512xbf16>, vector<16x512xf32> -> vector<16x512xf32>
    %11 = arith.maximumf %8, %10 : vector<16x512xf32>
    %cst_9 = arith.constant 0.000000e+00 : f32
    %12 = vector.broadcast %cst_9 : f32 to vector<16x512xf32>
    %13 = arith.maximumf %11, %12 : vector<16x512xf32>
    %14 = arith.truncf %13 : vector<16x512xf32> to vector<16x512xbf16>
    %c0_10 = arith.constant 0 : index
    %c0_11 = arith.constant 0 : index
    %15 = vector.load %arg3[%c0_10, %c0_11] : memref<512x128xbf16, #tpu.memory_space<vmem>>, vector<512x128xbf16>
    %cst_12 = arith.constant dense<0.000000e+00> : vector<16x128xf32>
    %16 = tpu.matmul %14, %15, %cst_12 {dimension_numbers = #tpu.dot_dimension_numbers<[1], [0], [0], [1], [0, 0, 1, 1], [], []>} : vector<16x512xbf16>, vector<512x128xbf16>, vector<16x128xf32> -> vector<16x128xf32>
    %c0_13 = arith.constant 0 : index
    %c0_14 = arith.constant 0 : index
    %17 = vector.load %arg4[%c0_13, %c0_14] : memref<16x128xf32, #tpu.memory_space<vmem>>, vector<16x128xf32>
    tpu.vector_store %arg4[%c0_13, %c0_14], %16 {strides = array<i32>} : memref<16x128xf32, #tpu.memory_space<vmem>>, vector<16x128xf32>,
    return
  }
  func.func @transform_0(%arg0: i32) -> (i32, i32) {
    %c0_i32 = arith.constant 0 : i32
    %c0_i32_0 = arith.constant 0 : i32
    return %arg0, %c0_i32 : i32, i32
  }
  func.func @transform_1(%arg0: i32) -> (i32, i32) {
    %c0_i32 = arith.constant 0 : i32
    %c0_i32_0 = arith.constant 0 : i32
    %c0_i32_1 = arith.constant 0 : i32
    return %c0_i32, %c0_i32_0 : i32, i32
  }
  func.func @transform_2(%arg0: i32) -> (i32, i32) {
    %c0_i32 = arith.constant 0 : i32
    %c0_i32_0 = arith.constant 0 : i32
    %c0_i32_1 = arith.constant 0 : i32
    return %c0_i32, %c0_i32_0 : i32, i32
  }
  func.func @transform_3(%arg0: i32) -> (i32, i32) {
    %c0_i32 = arith.constant 0 : i32
    %c0_i32_0 = arith.constant 0 : i32
    return %arg0, %c0_i32 : i32, i32
  }
}

</mosaic_0001>

<bundles_post_ra>
// kernel: tile.0
= control target key start
LH: loop header
LB: loop body
LE: loop exit
PB: predicated region body
PF: predicated region fallthrough
CT: control target
= control target key end

     0   :  { %vm130_vm0 = vcmask 261120   ;;  %s381_s14 = smov 32   ;;  %s382_s15 = smov 64   ;;  %vm144_vm1 = vcmask 1048320   ;;  %vm160_vm2 = vcmask 785920   ;;  %vm176_vm3 = vcmask 523520   ;;  %s454_s0 = inlined_call_operand.vmem [shape: bf16[64,32], index: 0, kind: input, shape index: {}]   ;;  %s455_s1 = inlined_call_operand.vmem [shape: bf16[1,2048], index: 1, kind: output, shape index: {}]  }
   0x1   :  { %v358_v0 = vld [vmem:[%s454_s0 + $0x18] sm:$0xff]   ;;  %v359_v1 = vld [vmem:[%s454_s0 + $0x10] sm:$0xff]   ;;  %v360_v2 = vld [vmem:[%s454_s0 + $0x8] sm:$0xff]   ;;  %v383_v35 = vmov 0.0  }
   0x2   :  { %v344_v3 = vunpack.c.l.bf16 %v358_v0  ;;  %v345_v4 = vunpack.c.h.bf16 %v358_v0  ;;  %v348_v5 = vunpack.c.l.bf16 %v359_v1  ;;  %v349_v6 = vunpack.c.h.bf16 %v359_v1  ;;  %v355_v7 = vld [vmem:[%s454_s0] sm:$0xff]   ;;  %s380_s0 = smov 96  }
   0x3   :  { %v352_v8 = vunpack.c.l.bf16 %v360_v2  ;;  %v353_v9 = vunpack.c.h.bf16 %v360_v2  ;;  %v356_v10 = vunpack.c.l.bf16 %v355_v7  ;;  %v357_v11 = vunpack.c.h.bf16 %v355_v7 }
   0x4   :  { %20 = vst [vmem:[#allocation1 + $0x38] sm:$0xff] %v345_v4  ;;  %36 = vst [vmem:[#allocation1 + $0x30] sm:$0xff] %v344_v3 }
   0x5   :  { %52 = vst [vmem:[#allocation1 + $0x28] sm:$0xff] %v349_v6  ;;  %68 = vst [vmem:[#allocation1 + $0x20] sm:$0xff] %v348_v5 }
   0x6   :  { %84 = vst [vmem:[#allocation1 + $0x18] sm:$0xff] %v353_v9  ;;  %100 = vst [vmem:[#allocation1 + $0x10] sm:$0xff] %v352_v8 }
   0x7   :  { %115 = vst [vmem:[#allocation1 + $0x8] sm:$0xff] %v357_v11  ;;  %128 = vst [vmem:[#allocation1] sm:$0xff] %v356_v10 }
   0xc   :  { %v148_v12 = vld [vmem:[#allocation1 + $0x23] ss:$4 sm:$0xff]   ;;  %v164_v13 = vld [vmem:[#allocation1 + $0x22] ss:$4 sm:$0xff]   ;;  %v180_v14 = vld [vmem:[#allocation1 + $0x21] ss:$4 sm:$0xff]  }
   0xd   :  { %v134_v21 = vld [vmem:[#allocation1 + $0x20] ss:$4 sm:$0xff]  }
   0xe   :  { %v141_v15 = vld [vmem:[#allocation1 + $0x3] ss:$4 sm:$0xff]   ;;  %v157_v16 = vld [vmem:[#allocation1 + $0x2] ss:$4 sm:$0xff]   ;;  %v173_v17 = vld [vmem:[#allocation1 + $0x1] ss:$4 sm:$0xff]  }
   0xf   :  { %v365_v18 = vpack.i.bf16 %v148_v12, %v141_v15  ;;  %v375_v19 = vpack.i.bf16 %v180_v14, %v173_v17  ;;  %v129_v20 = vld [vmem:[#allocation1] ss:$4 sm:$0xff]   ;;  %137 = vst.msk [vmem:[#allocation0 + $0x40] ss:$8 sm:$0xf] %vm130_vm0, %v134_v21   ;;  %v370_v22 = vpack.i.bf16 %v164_v13, %v157_v16 }
  0x10   :  { %131 = vst.msk [vmem:[#allocation0] ss:$8 sm:$0xf] %vm130_vm0, %v129_v20   ;;  %132 = vst.msk [vmem:[#allocation0] ss:$8 sm:$0xf0] %vm130_vm0, %v129_v20  }
  0x11   :  { %139 = vst.msk [vmem:[#allocation0 + $0x40] ss:$8 sm:$0xf0] %vm130_vm0, %v134_v21   ;;  %366 = vrot.lane.b32.xlu0 %v365_v18, %s380_s0  ;;  %376 = vrot.lane.b32.xlu1 %v375_v19, %s381_s14 }
  0x15   :  { %371 = vrot.lane.b32.xlu0 %v370_v22, %s382_s15 }
  0x83   :  { %v367_v23 = vpop.permute.xlu0 %366  ;;  %v377_v24 = vpop.permute.xlu1 %376 }
  0x84   :  { %v369_v25 = vunpack.i.h.bf16 %v367_v23  ;;  %v368_v26 = vunpack.i.l.bf16 %v367_v23  ;;  %v379_v28 = vunpack.i.h.bf16 %v377_v24  ;;  %v378_v29 = vunpack.i.l.bf16 %v377_v24 }
  0x86   :  { %145 = vst.msk [vmem:[#allocation0] ss:$8 sm:$0xf] %vm144_vm1, %v368_v26   ;;  %146 = vst.msk [vmem:[#allocation0] ss:$8 sm:$0xf0] %vm144_vm1, %v368_v26  }
  0x87   :  { %153 = vst.msk [vmem:[#allocation0 + $0x40] ss:$8 sm:$0xf] %vm144_vm1, %v369_v25   ;;  %155 = vst.msk [vmem:[#allocation0 + $0x40] ss:$8 sm:$0xf0] %vm144_vm1, %v369_v25   ;;  %v372_v27 = vpop.permute.xlu0 %371 }
  0x88   :  { %v374_v30 = vunpack.i.h.bf16 %v372_v27  ;;  %v373_v31 = vunpack.i.l.bf16 %v372_v27 }
  0x8a   :  { %161 = vst.msk [vmem:[#allocation0] ss:$8 sm:$0xf] %vm160_vm2, %v373_v31   ;;  %162 = vst.msk [vmem:[#allocation0] ss:$8 sm:$0xf0] %vm160_vm2, %v373_v31  }
  0x8b   :  { %169 = vst.msk [vmem:[#allocation0 + $0x40] ss:$8 sm:$0xf] %vm160_vm2, %v374_v30   ;;  %171 = vst.msk [vmem:[#allocation0 + $0x40] ss:$8 sm:$0xf0] %vm160_vm2, %v374_v30  }
  0x8c   :  { %177 = vst.msk [vmem:[#allocation0] ss:$8 sm:$0xf] %vm176_vm3, %v378_v29   ;;  %178 = vst.msk [vmem:[#allocation0] ss:$8 sm:$0xf0] %vm176_vm3, %v378_v29  }
  0x8d   :  { %185 = vst.msk [vmem:[#allocation0 + $0x40] ss:$8 sm:$0xf] %vm176_vm3, %v379_v28   ;;  %187 = vst.msk [vmem:[#allocation0 + $0x40] ss:$8 sm:$0xf0] %vm176_vm3, %v379_v28  }
  0x93   :  { %v192_v32 = vld [vmem:[#allocation0] sm:$0x3]  ;;  %v197_v33 = vld [vmem:[#allocation0 + $0x8] sm:$0x3]  ;;  %v203_v34 = vld [vmem:[#allocation0 + $0x10] sm:$0x3] }
  0x94   :  { %v193_v36 = vpack.c.bf16 %v383_v35, %v192_v32  ;;  %v198_v37 = vpack.c.bf16 %v383_v35, %v197_v33  ;;  %v204_v38 = vpack.c.bf16 %v383_v35, %v203_v34  ;;  %v210_v39 = vld [vmem:[#allocation0 + $0x18] sm:$0x3]  ;;  %v217_v40 = vld [vmem:[#allocation0 + $0x20] sm:$0x3]  ;;  %v224_v41 = vld [vmem:[#allocation0 + $0x28] sm:$0x3] }
  0x95   :  { %v211_v42 = vpack.c.bf16 %v383_v35, %v210_v39  ;;  %v218_v43 = vpack.c.bf16 %v383_v35, %v217_v40  ;;  %v225_v44 = vpack.c.bf16 %v383_v35, %v224_v41  ;;  %v231_v45 = vld [vmem:[#allocation0 + $0x30] sm:$0x3]  ;;  %v238_v46 = vld [vmem:[#allocation0 + $0x38] sm:$0x3]  ;;  %v245_v47 = vld [vmem:[#allocation0 + $0x40] sm:$0x3] }
  0x96   :  { %195 = vst [vmem:[%s455_s1] sm:$0x1] %v193_v36  ;;  %327 = vst [vmem:[%s455_s1 + $0x1] sm:$0x1] %v198_v37  ;;  %v232_v48 = vpack.c.bf16 %v383_v35, %v231_v45  ;;  %v239_v49 = vpack.c.bf16 %v383_v35, %v238_v46  ;;  %v246_v50 = vpack.c.bf16 %v383_v35, %v245_v47  ;;  %v252_v51 = vld [vmem:[#allocation0 + $0x48] sm:$0x3] }
  0x97   :  { %328 = vst [vmem:[%s455_s1 + $0x2] sm:$0x1] %v204_v38  ;;  %v259_v52 = vld [vmem:[#allocation0 + $0x50] sm:$0x3]  ;;  %v266_v53 = vld [vmem:[#allocation0 + $0x58] sm:$0x3]  ;;  %v253_v54 = vpack.c.bf16 %v383_v35, %v252_v51 }
  0x98   :  { %329 = vst [vmem:[%s455_s1 + $0x3] sm:$0x1] %v211_v42  ;;  %330 = vst [vmem:[%s455_s1 + $0x4] sm:$0x1] %v218_v43  ;;  %v260_v55 = vpack.c.bf16 %v383_v35, %v259_v52  ;;  %v267_v56 = vpack.c.bf16 %v383_v35, %v266_v53  ;;  %v273_v57 = vld [vmem:[#allocation0 + $0x60] sm:$0x3] }
  0x99   :  { %331 = vst [vmem:[%s455_s1 + $0x5] sm:$0x1] %v225_v44  ;;  %v280_v58 = vld [vmem:[#allocation0 + $0x68] sm:$0x3]  ;;  %v287_v59 = vld [vmem:[#allocation0 + $0x70] sm:$0x3]  ;;  %v274_v60 = vpack.c.bf16 %v383_v35, %v273_v57 }
  0x9a   :  { %332 = vst [vmem:[%s455_s1 + $0x6] sm:$0x1] %v232_v48  ;;  %333 = vst [vmem:[%s455_s1 + $0x7] sm:$0x1] %v239_v49  ;;  %v281_v61 = vpack.c.bf16 %v383_v35, %v280_v58  ;;  %v288_v62 = vpack.c.bf16 %v383_v35, %v287_v59  ;;  %v294_v63 = vld [vmem:[#allocation0 + $0x78] sm:$0x3] }
  0x9b   :  { %334 = vst [vmem:[%s455_s1 + $0x8] sm:$0x1] %v246_v50  ;;  %335 = vst [vmem:[%s455_s1 + $0x9] sm:$0x1] %v253_v54  ;;  %v295_v0 = vpack.c.bf16 %v383_v35, %v294_v63 }
  0x9c   :  { %336 = vst [vmem:[%s455_s1 + $0xa] sm:$0x1] %v260_v55  ;;  %337 = vst [vmem:[%s455_s1 + $0xb] sm:$0x1] %v267_v56 }
  0x9d   :  { %338 = vst [vmem:[%s455_s1 + $0xc] sm:$0x1] %v274_v60  ;;  %339 = vst [vmem:[%s455_s1 + $0xd] sm:$0x1] %v281_v61 }
  0x9e   :  { %340 = vst [vmem:[%s455_s1 + $0xe] sm:$0x1] %v288_v62  ;;  %341 = vst [vmem:[%s455_s1 + $0xf] sm:$0x1] %v295_v0 }

// kernel: _lambda_.1
= control target key start
LH: loop header
LB: loop body
LE: loop exit
PB: predicated region body
PF: predicated region fallthrough
CT: control target
= control target key end

     0   :  { %vm698_vm0 = vcmask 400384   ;;  %vm702_vm1 = vcmask 1040384   ;;  %s6041_s1 = inlined_call_operand.vmem [shape: bf16[433,2048], index: 1, kind: input, shape index: {}]   ;;  %s6042_s0 = inlined_call_operand.vmem [shape: bf16[16,433], index: 0, kind: input, shape index: {}]   ;;  %s6043_s2 = inlined_call_operand.vmem [shape: bf16[512,128], index: 2, kind: input, shape index: {}]   ;;  %s6044_s3 = inlined_call_operand.vmem [shape: f32[16,128], index: 3, kind: output, shape index: {}]  }
   0x1   :  { %v19_v0 = vld [vmem:[%s6041_s1] sm:$0xff]  ;;  %v20_v2 = vld [vmem:[%s6041_s1 + $0x8] sm:$0xff] }
   0x2   :  { %v21_v1 = vld [vmem:[%s6041_s1 + $0x40] sm:$0xff]  ;;  %v22_v4 = vld [vmem:[%s6041_s1 + $0x48] sm:$0xff] }
   0x3   :  { %v3806_v3 = vcombine.high %v19_v0, %v21_v1  ;;  %v3805_v5 = vcombine.low %v19_v0, %v21_v1  ;;  %v23_v6 = vld [vmem:[%s6041_s1 + $0x80] sm:$0xff]  ;;  %v3808_v8 = vcombine.high %v20_v2, %v22_v4  ;;  %v3807_v9 = vcombine.low %v20_v2, %v22_v4  ;;  %v24_v11 = vld [vmem:[%s6041_s1 + $0x88] sm:$0xff] }
   0x4   :  { %v25_v7 = vld [vmem:[%s6041_s1 + $0xc0] sm:$0xff]  ;;  %v26_v12 = vld [vmem:[%s6041_s1 + $0xc8] sm:$0xff] }
   0x5   :  { %v3810_v10 = vcombine.high %v23_v6, %v25_v7  ;;  %v27_v13 = vld [vmem:[%s6041_s1 + $0x100] sm:$0xff]  ;;  %717 = vmatprep.subr.bf16.mxu0 %v3806_v3  ;;  %v3812_v14 = vcombine.high %v24_v11, %v26_v12  ;;  %v28_v16 = vld [vmem:[%s6041_s1 + $0x108] sm:$0xff]  ;;  %803 = vmatprep.subr.bf16.mxu1 %v3808_v8  ;;  %v3809_v18 = vcombine.low %v23_v6, %v25_v7 }
   0x6   :  { %v29_v15 = vld [vmem:[%s6041_s1 + $0x140] sm:$0xff]  ;;  %v30_v17 = vld [vmem:[%s6041_s1 + $0x148] sm:$0xff]  ;;  %718 = vmatpush1.bf16.msra.mxu0 %v3805_v5  ;;  %804 = vmatpush1.bf16.msra.mxu1 %v3807_v9  ;;  %v3811_v19 = vcombine.low %v24_v11, %v26_v12 }
   0x7   :  { %719 = vmatprep.subr.bf16.mxu0 %v3810_v10  ;;  %v3814_v20 = vcombine.high %v27_v13, %v29_v15  ;;  %805 = vmatprep.subr.bf16.mxu1 %v3812_v14  ;;  %v3816_v21 = vcombine.high %v28_v16, %v30_v17  ;;  %v31_v22 = vld [vmem:[%s6041_s1 + $0x180] sm:$0xff]  ;;  %v32_v24 = vld [vmem:[%s6041_s1 + $0x188] sm:$0xff]  ;;  %v3813_v26 = vcombine.low %v27_v13, %v29_v15 }
   0x8   :  { %v33_v23 = vld [vmem:[%s6041_s1 + $0x1c0] sm:$0xff]  ;;  %v34_v25 = vld [vmem:[%s6041_s1 + $0x1c8] sm:$0xff]  ;;  %v3815_v27 = vcombine.low %v28_v16, %v30_v17 }
   0x9   :  { %v3818_v28 = vcombine.high %v31_v22, %v33_v23  ;;  %v3820_v29 = vcombine.high %v32_v24, %v34_v25  ;;  %v35_v30 = vld [vmem:[%s6041_s1 + $0x200] sm:$0xff]  ;;  %v36_v32 = vld [vmem:[%s6041_s1 + $0x208] sm:$0xff]  ;;  %v3817_v34 = vcombine.low %v31_v22, %v33_v23  ;;  %v3819_v35 = vcombine.low %v32_v24, %v34_v25 }
   0xa   :  { %720 = vmatpush1.bf16.msra.mxu0 %v3809_v18  ;;  %806 = vmatpush1.bf16.msra.mxu1 %v3811_v19  ;;  %v37_v31 = vld [vmem:[%s6041_s1 + $0x240] sm:$0xff]  ;;  %v38_v33 = vld [vmem:[%s6041_s1 + $0x248] sm:$0xff] }
   0xb   :  { %721 = vmatprep.subr.bf16.mxu0 %v3814_v20  ;;  %807 = vmatprep.subr.bf16.mxu1 %v3816_v21  ;;  %v3822_v36 = vcombine.high %v35_v30, %v37_v31  ;;  %v3824_v37 = vcombine.high %v36_v32, %v38_v33  ;;  %v39_v38 = vld [vmem:[%s6041_s1 + $0x280] sm:$0xff]  ;;  %v40_v40 = vld [vmem:[%s6041_s1 + $0x288] sm:$0xff]  ;;  %v3821_v42 = vcombine.low %v35_v30, %v37_v31 }
   0xc   :  { %v41_v39 = vld [vmem:[%s6041_s1 + $0x2c0] sm:$0xff]  ;;  %v42_v41 = vld [vmem:[%s6041_s1 + $0x2c8] sm:$0xff]  ;;  %v3823_v43 = vcombine.low %v36_v32, %v38_v33 }
   0xd   :  { %v3826_v44 = vcombine.high %v39_v38, %v41_v39  ;;  %v3828_v45 = vcombine.high %v40_v40, %v42_v41  ;;  %v43_v46 = vld [vmem:[%s6041_s1 + $0x300] sm:$0xff]  ;;  %v44_v48 = vld [vmem:[%s6041_s1 + $0x308] sm:$0xff]  ;;  %v3825_v50 = vcombine.low %v39_v38, %v41_v39  ;;  %v3827_v51 = vcombine.low %v40_v40, %v42_v41 }
   0xe   :  { %722 = vmatpush1.bf16.msra.mxu0 %v3813_v26  ;;  %808 = vmatpush1.bf16.msra.mxu1 %v3815_v27  ;;  %v45_v47 = vld [vmem:[%s6041_s1 + $0x340] sm:$0xff]  ;;  %v46_v49 = vld [vmem:[%s6041_s1 + $0x348] sm:$0xff] }
   0xf   :  { %723 = vmatprep.subr.bf16.mxu0 %v3818_v28  ;;  %809 = vmatprep.subr.bf16.mxu1 %v3820_v29  ;;  %v3830_v52 = vcombine.high %v43_v46, %v45_v47  ;;  %v3832_v53 = vcombine.high %v44_v48, %v46_v49  ;;  %v47_v54 = vld [vmem:[%s6041_s1 + $0x380] sm:$0xff]  ;;  %v48_v57 = vld [vmem:[%s6041_s1 + $0x388] sm:$0xff]  ;;  %v3829_v59 = vcombine.low %v43_v46, %v45_v47 }
  0x10   :  { %v49_v55 = vld [vmem:[%s6041_s1 + $0x3c0] sm:$0xff]  ;;  %v50_v58 = vld [vmem:[%s6041_s1 + $0x3c8] sm:$0xff]  ;;  %v3831_v60 = vcombine.low %v44_v48, %v46_v49 }
  0x11   :  { %v4542_v56 = vld [vmem:[%s6042_s0 + $0x4] ss:$16 sps:$4 sm:$0xff]   ;;  %v3834_v61 = vcombine.high %v47_v54, %v49_v55  ;;  %v3836_v62 = vcombine.high %v48_v57, %v50_v58  ;;  %v52_v1 = vld [vmem:[%s6041_s1 + $0x408] sm:$0xff]  ;;  %v3833_v3 = vcombine.low %v47_v54, %v49_v55  ;;  %v3835_v4 = vcombine.low %v48_v57, %v50_v58 }
  0x12   :  { %724 = vmatpush1.bf16.msra.mxu0 %v3817_v34  ;;  %810 = vmatpush1.bf16.msra.mxu1 %v3819_v35  ;;  %v51_v63 = vld [vmem:[%s6041_s1 + $0x400] sm:$0xff]  ;;  %v54_v2 = vld [vmem:[%s6041_s1 + $0x448] sm:$0xff] }
  0x13   :  { %725 = vmatprep.subr.bf16.mxu0 %v3822_v36  ;;  %811 = vmatprep.subr.bf16.mxu1 %v3824_v37  ;;  %v53_v0 = vld [vmem:[%s6041_s1 + $0x440] sm:$0xff]  ;;  %v3840_v6 = vcombine.high %v52_v1, %v54_v2  ;;  %v56_v9 = vld [vmem:[%s6041_s1 + $0x488] sm:$0xff]  ;;  %v3839_v12 = vcombine.low %v52_v1, %v54_v2 }
  0x14   :  { %749 = vmatprep.mubr.bf16.mxu0 %v4542_v56  ;;  %835 = vmatprep.mubr.bf16.mxu1 %v4542_v56  ;;  %v3838_v5 = vcombine.high %v51_v63, %v53_v0  ;;  %v55_v7 = vld [vmem:[%s6041_s1 + $0x480] sm:$0xff]  ;;  %v58_v10 = vld [vmem:[%s6041_s1 + $0x4c8] sm:$0xff]  ;;  %v3837_v11 = vcombine.low %v51_v63, %v53_v0 }
  0x15   :  { %v57_v8 = vld [vmem:[%s6041_s1 + $0x4c0] sm:$0xff]  ;;  %v3844_v14 = vcombine.high %v56_v9, %v58_v10  ;;  %v60_v17 = vld [vmem:[%s6041_s1 + $0x508] sm:$0xff]  ;;  %v3843_v20 = vcombine.low %v56_v9, %v58_v10 }
  0x16   :  { %726 = vmatpush1.bf16.msra.mxu0 %v3821_v42  ;;  %812 = vmatpush1.bf16.msra.mxu1 %v3823_v43  ;;  %v3842_v13 = vcombine.high %v55_v7, %v57_v8  ;;  %v59_v15 = vld [vmem:[%s6041_s1 + $0x500] sm:$0xff]  ;;  %v62_v18 = vld [vmem:[%s6041_s1 + $0x548] sm:$0xff]  ;;  %v3841_v19 = vcombine.low %v55_v7, %v57_v8 }
  0x17   :  { %727 = vmatprep.subr.bf16.mxu0 %v3826_v44  ;;  %813 = vmatprep.subr.bf16.mxu1 %v3828_v45  ;;  %v61_v16 = vld [vmem:[%s6041_s1 + $0x540] sm:$0xff]  ;;  %v3848_v23 = vcombine.high %v60_v17, %v62_v18  ;;  %v64_v25 = vld [vmem:[%s6041_s1 + $0x588] sm:$0xff]  ;;  %v3847_v28 = vcombine.low %v60_v17, %v62_v18 }
  0x18   :  { %v3846_v21 = vcombine.high %v59_v15, %v61_v16  ;;  %v63_v22 = vld [vmem:[%s6041_s1 + $0x580] sm:$0xff]  ;;  %v66_v26 = vld [vmem:[%s6041_s1 + $0x5c8] sm:$0xff]  ;;  %v3845_v27 = vcombine.low %v59_v15, %v61_v16 }
  0x19   :  { %v65_v24 = vld [vmem:[%s6041_s1 + $0x5c0] sm:$0xff]  ;;  %v3852_v30 = vcombine.high %v64_v25, %v66_v26  ;;  %v68_v33 = vld [vmem:[%s6041_s1 + $0x608] sm:$0xff]  ;;  %v3851_v36 = vcombine.low %v64_v25, %v66_v26 }
  0x1a   :  { %728 = vmatpush1.bf16.msra.mxu0 %v3825_v50  ;;  %814 = vmatpush1.bf16.msra.mxu1 %v3827_v51  ;;  %v3850_v29 = vcombine.high %v63_v22, %v65_v24  ;;  %v67_v31 = vld [vmem:[%s6041_s1 + $0x600] sm:$0xff]  ;;  %v70_v34 = vld [vmem:[%s6041_s1 + $0x648] sm:$0xff]  ;;  %v3849_v35 = vcombine.low %v63_v22, %v65_v24 }
  0x1b   :  { %729 = vmatprep.subr.bf16.mxu0 %v3830_v52  ;;  %815 = vmatprep.subr.bf16.mxu1 %v3832_v53  ;;  %v69_v32 = vld [vmem:[%s6041_s1 + $0x640] sm:$0xff]  ;;  %v3856_v38 = vcombine.high %v68_v33, %v70_v34  ;;  %v72_v41 = vld [vmem:[%s6041_s1 + $0x688] sm:$0xff]  ;;  %v3855_v44 = vcombine.low %v68_v33, %v70_v34 }
  0x1c   :  { %v3854_v37 = vcombine.high %v67_v31, %v69_v32  ;;  %v71_v39 = vld [vmem:[%s6041_s1 + $0x680] sm:$0xff]  ;;  %v74_v42 = vld [vmem:[%s6041_s1 + $0x6c8] sm:$0xff]  ;;  %v3853_v43 = vcombine.low %v67_v31, %v69_v32 }
  0x1d   :  { %v73_v40 = vld [vmem:[%s6041_s1 + $0x6c0] sm:$0xff]  ;;  %v3860_v46 = vcombine.high %v72_v41, %v74_v42  ;;  %v76_v49 = vld [vmem:[%s6041_s1 + $0x708] sm:$0xff]  ;;  %v3859_v52 = vcombine.low %v72_v41, %v74_v42 }
  0x1e   :  { %730 = vmatpush1.bf16.msra.mxu0 %v3829_v59  ;;  %816 = vmatpush1.bf16.msra.mxu1 %v3831_v60  ;;  %v3858_v45 = vcombine.high %v71_v39, %v73_v40  ;;  %v75_v47 = vld [vmem:[%s6041_s1 + $0x700] sm:$0xff]  ;;  %v78_v50 = vld [vmem:[%s6041_s1 + $0x748] sm:$0xff]  ;;  %v3857_v51 = vcombine.low %v71_v39, %v73_v40 }
  0x1f   :  { %731 = vmatprep.subr.bf16.mxu0 %v3834_v61  ;;  %817 = vmatprep.subr.bf16.mxu1 %v3836_v62  ;;  %v77_v48 = vld [vmem:[%s6041_s1 + $0x740] sm:$0xff]  ;;  %v3864_v54 = vcombine.high %v76_v49, %v78_v50  ;;  %v80_v58 = vld [vmem:[%s6041_s1 + $0x788] sm:$0xff]  ;;  %v3863_v61 = vcombine.low %v76_v49, %v78_v50 }
  0x20   :  { %v3862_v53 = vcombine.high %v75_v47, %v77_v48  ;;  %v79_v55 = vld [vmem:[%s6041_s1 + $0x780] sm:$0xff]  ;;  %v82_v59 = vld [vmem:[%s6041_s1 + $0x7c8] sm:$0xff]  ;;  %v3861_v60 = vcombine.low %v75_v47, %v77_v48 }
  0x21   :  { %v81_v57 = vld [vmem:[%s6041_s1 + $0x7c0] sm:$0xff]  ;;  %v3868_v63 = vcombine.high %v80_v58, %v82_v59  ;;  %v84_v2 = vld [vmem:[%s6041_s1 + $0x808] sm:$0xff] }
  0x22   :  { %732 = vmatpush1.bf16.msra.mxu0 %v3833_v3  ;;  %818 = vmatpush1.bf16.msra.mxu1 %v3835_v4  ;;  %v3866_v62 = vcombine.high %v79_v55, %v81_v57  ;;  %v83_v0 = vld [vmem:[%s6041_s1 + $0x800] sm:$0xff]  ;;  %v86_v3 = vld [vmem:[%s6041_s1 + $0x848] sm:$0xff]  ;;  %v3865_v4 = vcombine.low %v79_v55, %v81_v57 }
  0x23   :  { %733 = vmatprep.subr.bf16.mxu0 %v3838_v5  ;;  %819 = vmatprep.subr.bf16.mxu1 %v3840_v6  ;;  %v85_v1 = vld [vmem:[%s6041_s1 + $0x840] sm:$0xff]  ;;  %v3867_v5 = vcombine.low %v80_v58, %v82_v59  ;;  %v3872_v7 = vcombine.high %v84_v2, %v86_v3 }
  0x24   :  { %v3870_v6 = vcombine.high %v83_v0, %v85_v1  ;;  %v87_v8 = vld [vmem:[%s6041_s1 + $0x880] sm:$0xff] }
  0x25   :  { %v89_v9 = vld [vmem:[%s6041_s1 + $0x8c0] sm:$0xff] }
  0x26   :  { %734 = vmatpush1.bf16.msra.mxu0 %v3837_v11  ;;  %820 = vmatpush1.bf16.msra.mxu1 %v3839_v12  ;;  %v4669_v10 = vld [vmem:[%s6042_s0] ss:$16 sps:$4 sm:$0xff]   ;;  %v88_v11 = vld [vmem:[%s6041_s1 + $0x888] sm:$0xff]  ;;  %v3874_v15 = vcombine.high %v87_v8, %v89_v9  ;;  %v3873_v22 = vcombine.low %v87_v8, %v89_v9 }
  0x27   :  { %735 = vmatprep.subr.bf16.mxu0 %v3842_v13  ;;  %821 = vmatprep.subr.bf16.mxu1 %v3844_v14  ;;  %v90_v12 = vld [vmem:[%s6041_s1 + $0x8c8] sm:$0xff]  ;;  %v3869_v13 = vcombine.low %v83_v0, %v85_v1  ;;  %v3871_v14 = vcombine.low %v84_v2, %v86_v3  ;;  %v91_v17 = vld [vmem:[%s6041_s1 + $0x900] sm:$0xff] }
  0x28   :  { %v3876_v16 = vcombine.high %v88_v11, %v90_v12  ;;  %v93_v18 = vld [vmem:[%s6041_s1 + $0x940] sm:$0xff] }
  0x29   :  { %v3878_v24 = vcombine.high %v91_v17, %v93_v18  ;;  %v95_v26 = vld [vmem:[%s6041_s1 + $0x980] sm:$0xff] }
  0x2a   :  { %736 = vmatpush1.bf16.msra.mxu0 %v3841_v19  ;;  %822 = vmatpush1.bf16.msra.mxu1 %v3843_v20  ;;  %v4686_v19 = vld [vmem:[%s6042_s0 + $0xc] ss:$16 sps:$4 sm:$0xff]   ;;  %v99_v34 = vld [vmem:[%s6041_s1 + $0xa00] sm:$0xff] }
  0x2b   :  { %737 = vmatprep.subr.bf16.mxu0 %v3846_v21  ;;  %823 = vmatprep.subr.bf16.mxu1 %v3848_v23  ;;  %v92_v20 = vld [vmem:[%s6041_s1 + $0x908] sm:$0xff]  ;;  %v3875_v23 = vcombine.low %v88_v11, %v90_v12  ;;  %v103_v42 = vld [vmem:[%s6041_s1 + $0xa80] sm:$0xff] }
  0x2c   :  { %v94_v21 = vld [vmem:[%s6041_s1 + $0x948] sm:$0xff]  ;;  %v107_v50 = vld [vmem:[%s6041_s1 + $0xb00] sm:$0xff] }
  0x2d   :  { %v3880_v25 = vcombine.high %v92_v20, %v94_v21  ;;  %v3879_v31 = vcombine.low %v92_v20, %v94_v21  ;;  %v111_v59 = vld [vmem:[%s6041_s1 + $0xb80] sm:$0xff] }
  0x2e   :  { %738 = vmatpush1.bf16.msra.mxu0 %v3845_v27  ;;  %824 = vmatpush1.bf16.msra.mxu1 %v3847_v28  ;;  %v97_v27 = vld [vmem:[%s6041_s1 + $0x9c0] sm:$0xff]  ;;  %v96_v28 = vld [vmem:[%s6041_s1 + $0x988] sm:$0xff] }
  0x2f   :  { %739 = vmatprep.subr.bf16.mxu0 %v3850_v29  ;;  %825 = vmatprep.subr.bf16.mxu1 %v3852_v30  ;;  %v98_v29 = vld [vmem:[%s6041_s1 + $0x9c8] sm:$0xff]  ;;  %v3877_v30 = vcombine.low %v91_v17, %v93_v18  ;;  %v3882_v32 = vcombine.high %v95_v26, %v97_v27  ;;  %v115_v3 = vld [vmem:[%s6041_s1 + $0xc00] sm:$0xff] }
  0x30   :  { %v3884_v33 = vcombine.high %v96_v28, %v98_v29  ;;  %v3883_v39 = vcombine.low %v96_v28, %v98_v29  ;;  %v119_v12 = vld [vmem:[%s6041_s1 + $0xc80] sm:$0xff] }
  0x31   :  { %v123_v21 = vld [vmem:[%s6041_s1 + $0xd00] sm:$0xff] }
  0x32   :  { %740 = vmatpush1.bf16.msra.mxu0 %v3849_v35  ;;  %826 = vmatpush1.bf16.msra.mxu1 %v3851_v36  ;;  %v101_v35 = vld [vmem:[%s6041_s1 + $0xa40] sm:$0xff]  ;;  %v100_v36 = vld [vmem:[%s6041_s1 + $0xa08] sm:$0xff] }
  0x33   :  { %741 = vmatprep.subr.bf16.mxu0 %v3854_v37  ;;  %827 = vmatprep.subr.bf16.mxu1 %v3856_v38  ;;  %v102_v37 = vld [vmem:[%s6041_s1 + $0xa48] sm:$0xff]  ;;  %v3881_v38 = vcombine.low %v95_v26, %v97_v27  ;;  %v3886_v40 = vcombine.high %v99_v34, %v101_v35 }
  0x34   :  { %v3888_v41 = vcombine.high %v100_v36, %v102_v37  ;;  %v3887_v47 = vcombine.low %v100_v36, %v102_v37  ;;  %v128_v26 = vld [vmem:[%s6041_s1 + $0xd88] sm:$0x11] }
  0x36   :  { %742 = vmatpush1.bf16.msra.mxu0 %v3853_v43  ;;  %828 = vmatpush1.bf16.msra.mxu1 %v3855_v44  ;;  %v105_v43 = vld [vmem:[%s6041_s1 + $0xac0] sm:$0xff]  ;;  %v104_v44 = vld [vmem:[%s6041_s1 + $0xa88] sm:$0xff] }
  0x37   :  { %743 = vmatprep.subr.bf16.mxu0 %v3858_v45  ;;  %829 = vmatprep.subr.bf16.mxu1 %v3860_v46  ;;  %v106_v45 = vld [vmem:[%s6041_s1 + $0xac8] sm:$0xff]  ;;  %v3885_v46 = vcombine.low %v99_v34, %v101_v35  ;;  %v3890_v48 = vcombine.high %v103_v42, %v105_v43  ;;  %v3916_v34 = vcombine.high %v128_v26, %v128_v26 }
  0x38   :  { %v3892_v49 = vcombine.high %v104_v44, %v106_v45  ;;  %v3891_v55 = vcombine.low %v104_v44, %v106_v45  ;;  %v892_v44 = vld [vmem:[%s6041_s1 + $0x58] sm:$0xff] }
  0x3a   :  { %744 = vmatpush1.bf16.msra.mxu0 %v3857_v51  ;;  %830 = vmatpush1.bf16.msra.mxu1 %v3859_v52  ;;  %v109_v51 = vld [vmem:[%s6041_s1 + $0xb40] sm:$0xff]  ;;  %v108_v52 = vld [vmem:[%s6041_s1 + $0xb08] sm:$0xff] }
  0x3b   :  { %745 = vmatprep.subr.bf16.mxu0 %v3862_v53  ;;  %831 = vmatprep.subr.bf16.mxu1 %v3864_v54  ;;  %v110_v53 = vld [vmem:[%s6041_s1 + $0xb48] sm:$0xff]  ;;  %v3889_v54 = vcombine.low %v103_v42, %v105_v43  ;;  %v3894_v57 = vcombine.high %v107_v50, %v109_v51  ;;  %v891_v42 = vld [vmem:[%s6041_s1 + $0x50] sm:$0xff]  ;;  %v890_v43 = vld [vmem:[%s6041_s1 + $0x18] sm:$0xff] }
  0x3c   :  { %v3896_v58 = vcombine.high %v108_v52, %v110_v53  ;;  %v3895_v0 = vcombine.low %v108_v52, %v110_v53  ;;  %v894_v52 = vld [vmem:[%s6041_s1 + $0x98] sm:$0xff] }
  0x3d   :  { %v896_v53 = vld [vmem:[%s6041_s1 + $0xd8] sm:$0xff] }
  0x3e   :  { %746 = vmatpush1.bf16.msra.mxu0 %v3861_v60  ;;  %832 = vmatpush1.bf16.msra.mxu1 %v3863_v61  ;;  %v113_v60 = vld [vmem:[%s6041_s1 + $0xbc0] sm:$0xff]  ;;  %v112_v61 = vld [vmem:[%s6041_s1 + $0xb88] sm:$0xff] }
  0x3f   :  { %747 = vmatprep.subr.bf16.mxu0 %v3866_v62  ;;  %833 = vmatprep.subr.bf16.mxu1 %v3868_v63  ;;  %v114_v62 = vld [vmem:[%s6041_s1 + $0xbc8] sm:$0xff]  ;;  %v3893_v63 = vcombine.low %v107_v50, %v109_v51  ;;  %v3898_v1 = vcombine.high %v111_v59, %v113_v60  ;;  %v895_v50 = vld [vmem:[%s6041_s1 + $0xd0] sm:$0xff] }
  0x40   :  { %v3900_v2 = vcombine.high %v112_v61, %v114_v62  ;;  %v3899_v8 = vcombine.low %v112_v61, %v114_v62  ;;  %v4829_v51 = vld [vmem:[%s6042_s0 + $0x8] ss:$16 sps:$4 sm:$0xff]  }
  0x41   :  { %v898_v61 = vld [vmem:[%s6041_s1 + $0x118] sm:$0xff] }
  0x42   :  { %748 = vmatpush1.bf16.msra.mxu0 %v3865_v4  ;;  %834 = vmatpush1.bf16.msra.mxu1 %v3867_v5  ;;  %v117_v4 = vld [vmem:[%s6041_s1 + $0xc40] sm:$0xff]  ;;  %v116_v5 = vld [vmem:[%s6041_s1 + $0xc08] sm:$0xff]  ;;  %v900_v62 = vld [vmem:[%s6041_s1 + $0x158] sm:$0xff] }
  0x43   :  { %760 = vmatprep.subr.bf16.mxu0 %v3870_v6  ;;  %846 = vmatprep.subr.bf16.mxu1 %v3872_v7  ;;  %v118_v6 = vld [vmem:[%s6041_s1 + $0xc48] sm:$0xff]  ;;  %v3897_v7 = vcombine.low %v111_v59, %v113_v60  ;;  %v3902_v9 = vcombine.high %v115_v3, %v117_v4  ;;  %v897_v59 = vld [vmem:[%s6041_s1 + $0x110] sm:$0xff] }
  0x44   :  { %v3904_v11 = vcombine.high %v116_v5, %v118_v6  ;;  %v3903_v17 = vcombine.low %v116_v5, %v118_v6  ;;  %v899_v60 = vld [vmem:[%s6041_s1 + $0x150] sm:$0xff]  ;;  %v902_v5 = vld [vmem:[%s6041_s1 + $0x198] sm:$0xff] }
  0x45   :  { %750 = vmatmul.mubr.bf16.vlgmr.msra.gmra.mrb[0].mxu0 %v4669_v10  ;;  %836 = vmatmul.mubr.bf16.vlgmr.msra.gmra.mrb[0].mxu1 %v4669_v10  ;;  %v904_v6 = vld [vmem:[%s6041_s1 + $0x1d8] sm:$0xff] }
  0x46   :  { %761 = vmatpush1.bf16.msra.mxu0 %v3869_v13  ;;  %847 = vmatpush1.bf16.msra.mxu1 %v3871_v14  ;;  %v121_v13 = vld [vmem:[%s6041_s1 + $0xcc0] sm:$0xff]  ;;  %v120_v14 = vld [vmem:[%s6041_s1 + $0xc88] sm:$0xff] }
  0x47   :  { %762 = vmatprep.subr.bf16.mxu0 %v3874_v15  ;;  %848 = vmatprep.subr.bf16.mxu1 %v3876_v16  ;;  %v122_v15 = vld [vmem:[%s6041_s1 + $0xcc8] sm:$0xff]  ;;  %v3901_v16 = vcombine.low %v115_v3, %v117_v4  ;;  %v3906_v18 = vcombine.high %v119_v12, %v121_v13  ;;  %v3905_v27 = vcombine.low %v119_v12, %v121_v13  ;;  %v901_v3 = vld [vmem:[%s6041_s1 + $0x190] sm:$0xff] }
  0x48   :  { %3917 = vmatprep.mubr.msk.bf16.mxu0 %vm698_vm0, %v4686_v19  ;;  %3918 = vmatprep.mubr.msk.bf16.mxu1 %vm698_vm0, %v4686_v19  ;;  %v3908_v20 = vcombine.high %v120_v14, %v122_v15  ;;  %v3907_v28 = vcombine.low %v120_v14, %v122_v15  ;;  %v903_v4 = vld [vmem:[%s6041_s1 + $0x1d0] sm:$0xff]  ;;  %v908_v14 = vld [vmem:[%s6041_s1 + $0x258] sm:$0xff] }
  0x49   :  { %v905_v12 = vld [vmem:[%s6041_s1 + $0x210] sm:$0xff]  ;;  %v3931_v15 = vcombine.low %v901_v3, %v903_v4 }
  0x4a   :  { %763 = vmatpush1.bf16.msra.mxu0 %v3873_v22  ;;  %849 = vmatpush1.bf16.msra.mxu1 %v3875_v23  ;;  %v125_v22 = vld [vmem:[%s6041_s1 + $0xd40] sm:$0xff]  ;;  %v907_v13 = vld [vmem:[%s6041_s1 + $0x250] sm:$0xff] }
  0x4b   :  { %764 = vmatprep.subr.bf16.mxu0 %v3878_v24  ;;  %850 = vmatprep.subr.bf16.mxu1 %v3880_v25  ;;  %v127_v23 = vld [vmem:[%s6041_s1 + $0xd80] sm:$0x11]  ;;  %v124_v24 = vld [vmem:[%s6041_s1 + $0xd08] sm:$0xff]  ;;  %v3910_v29 = vcombine.high %v123_v21, %v125_v22  ;;  %v3909_v35 = vcombine.low %v123_v21, %v125_v22  ;;  %v911_v21 = vld [vmem:[%s6041_s1 + $0x2d0] sm:$0xff] }
  0x4c   :  { %v126_v25 = vld [vmem:[%s6041_s1 + $0xd48] sm:$0xff]  ;;  %v3913_v36 = vcombine.low %v127_v23, %v127_v23  ;;  %v910_v22 = vld [vmem:[%s6041_s1 + $0x298] sm:$0xff] }
  0x4d   :  { %v3911_v37 = vcombine.low %v124_v24, %v126_v25 }
  0x4e   :  { %765 = vmatpush1.bf16.msra.mxu0 %v3877_v30  ;;  %851 = vmatpush1.bf16.msra.mxu1 %v3879_v31  ;;  %v3914_v30 = vcombine.high %v127_v23, %v127_v23  ;;  %v3912_v31 = vcombine.high %v124_v24, %v126_v25  ;;  %v912_v23 = vld [vmem:[%s6041_s1 + $0x2d8] sm:$0xff]  ;;  %v3935_v24 = vcombine.low %v905_v12, %v907_v13 }
  0x4f   :  { %766 = vmatprep.subr.bf16.mxu0 %v3882_v32  ;;  %852 = vmatprep.subr.bf16.mxu1 %v3884_v33  ;;  %v4428_v32 = vmov 0  }
  0x50   :  { %v4802_v33 = vsel %vm702_vm1, 65535, %v4428_v32 }
  0x51   :  { %v706_v45 = vand.u32 %v3913_v36, %v4802_v33 }
  0x52   :  { %767 = vmatpush1.bf16.msra.mxu0 %v3881_v38  ;;  %853 = vmatpush1.bf16.msra.mxu1 %v3883_v39  ;;  %v709_v38 = vand.u32 %v3914_v30, %v4802_v33  ;;  %v3915_v39 = vcombine.low %v128_v26, %v128_v26  ;;  %v914_v30 = vld [vmem:[%s6041_s1 + $0x318] sm:$0xff] }
  0x53   :  { %768 = vmatprep.subr.bf16.mxu0 %v3886_v40  ;;  %854 = vmatprep.subr.bf16.mxu1 %v3888_v41  ;;  %v715_v40 = vand.u32 %v3916_v34, %v4802_v33  ;;  %v889_v41 = vld [vmem:[%s6041_s1 + $0x10] sm:$0xff]  ;;  %v3941_v34 = vcombine.low %v910_v22, %v912_v23 }
  0x56   :  { %769 = vmatpush1.bf16.msra.mxu0 %v3885_v46  ;;  %855 = vmatpush1.bf16.msra.mxu1 %v3887_v47  ;;  %v712_v46 = vand.u32 %v3915_v39, %v4802_v33  ;;  %v3920_v47 = vcombine.high %v889_v41, %v891_v42  ;;  %v918_v39 = vld [vmem:[%s6041_s1 + $0x398] sm:$0xff] }
  0x57   :  { %770 = vmatprep.subr.bf16.mxu0 %v3890_v48  ;;  %856 = vmatprep.subr.bf16.mxu1 %v3892_v49  ;;  %v3922_v48 = vcombine.high %v890_v43, %v892_v44  ;;  %v893_v49 = vld [vmem:[%s6041_s1 + $0x90] sm:$0xff] }
  0x5a   :  { %771 = vmatpush1.bf16.msra.mxu0 %v3889_v54  ;;  %857 = vmatpush1.bf16.msra.mxu1 %v3891_v55  ;;  %v3919_v54 = vcombine.low %v889_v41, %v891_v42  ;;  %v3921_v55 = vcombine.low %v890_v43, %v892_v44 }
  0x5b   :  { %772 = vmatprep.subr.bf16.mxu0 %v3894_v57  ;;  %858 = vmatprep.subr.bf16.mxu1 %v3896_v58  ;;  %v3924_v57 = vcombine.high %v893_v49, %v895_v50  ;;  %v3926_v58 = vcombine.high %v894_v52, %v896_v53 }
  0x5e   :  { %773 = vmatpush1.bf16.msra.mxu0 %v3893_v63  ;;  %859 = vmatpush1.bf16.msra.mxu1 %v3895_v0  ;;  %v3923_v63 = vcombine.low %v893_v49, %v895_v50  ;;  %v3925_v0 = vcombine.low %v894_v52, %v896_v53 }
  0x5f   :  { %774 = vmatprep.subr.bf16.mxu0 %v3898_v1  ;;  %860 = vmatprep.subr.bf16.mxu1 %v3900_v2  ;;  %v3928_v1 = vcombine.high %v897_v59, %v899_v60  ;;  %v3930_v2 = vcombine.high %v898_v61, %v900_v62 }
  0x62   :  { %775 = vmatpush1.bf16.msra.mxu0 %v3897_v7  ;;  %861 = vmatpush1.bf16.msra.mxu1 %v3899_v8  ;;  %v3927_v7 = vcombine.low %v897_v59, %v899_v60  ;;  %v3929_v8 = vcombine.low %v898_v61, %v900_v62 }
  0x63   :  { %776 = vmatprep.subr.bf16.mxu0 %v3902_v9  ;;  %862 = vmatprep.subr.bf16.mxu1 %v3904_v11  ;;  %v3932_v9 = vcombine.high %v901_v3, %v903_v4  ;;  %v3934_v11 = vcombine.high %v902_v5, %v904_v6 }
  0x66   :  { %777 = vmatpush1.bf16.msra.mxu0 %v3901_v16  ;;  %863 = vmatpush1.bf16.msra.mxu1 %v3903_v17  ;;  %v3933_v16 = vcombine.low %v902_v5, %v904_v6  ;;  %v3936_v17 = vcombine.high %v905_v12, %v907_v13 }
  0x67   :  { %778 = vmatprep.subr.bf16.mxu0 %v3906_v18  ;;  %864 = vmatprep.subr.bf16.mxu1 %v3908_v20  ;;  %v909_v20 = vld [vmem:[%s6041_s1 + $0x290] sm:$0xff] }
  0x68   :  { %v3940_v26 = vcombine.high %v909_v20, %v911_v21  ;;  %v3939_v32 = vcombine.low %v909_v20, %v911_v21 }
  0x6a   :  { %779 = vmatpush1.bf16.msra.mxu0 %v3905_v27  ;;  %865 = vmatpush1.bf16.msra.mxu1 %v3907_v28  ;;  %v3942_v27 = vcombine.high %v910_v22, %v912_v23  ;;  %v913_v28 = vld [vmem:[%s6041_s1 + $0x310] sm:$0xff] }
  0x6b   :  { %780 = vmatprep.subr.bf16.mxu0 %v3910_v29  ;;  %866 = vmatprep.subr.bf16.mxu1 %v3912_v31  ;;  %v915_v29 = vld [vmem:[%s6041_s1 + $0x350] sm:$0xff]  ;;  %v916_v31 = vld [vmem:[%s6041_s1 + $0x358] sm:$0xff] }
  0x6c   :  { %v3946_v36 = vcombine.high %v914_v30, %v916_v31  ;;  %v3943_v41 = vcombine.low %v913_v28, %v915_v29  ;;  %v3945_v42 = vcombine.low %v914_v30, %v916_v31 }
  0x6e   :  { %781 = vmatpush1.bf16.msra.mxu0 %v3909_v35  ;;  %867 = vmatpush1.bf16.msra.mxu1 %v3911_v37  ;;  %v3944_v35 = vcombine.high %v913_v28, %v915_v29  ;;  %v917_v37 = vld [vmem:[%s6041_s1 + $0x390] sm:$0xff] }
  0x6f   :  { %782 = vmatprep.subr.bf16.mxu0 %v709_v38  ;;  %868 = vmatprep.subr.bf16.mxu1 %v715_v40  ;;  %v919_v38 = vld [vmem:[%s6041_s1 + $0x3d0] sm:$0xff]  ;;  %v920_v40 = vld [vmem:[%s6041_s1 + $0x3d8] sm:$0xff] }
  0x70   :  { %v3948_v43 = vcombine.high %v917_v37, %v919_v38  ;;  %v3950_v44 = vcombine.high %v918_v39, %v920_v40  ;;  %v3947_v49 = vcombine.low %v917_v37, %v919_v38  ;;  %v3949_v50 = vcombine.low %v918_v39, %v920_v40 }
  0x72   :  { %783 = vmatpush1.bf16.msra.mxu0 %v706_v45  ;;  %869 = vmatpush1.bf16.msra.mxu1 %v712_v46  ;;  %v921_v45 = vld [vmem:[%s6041_s1 + $0x410] sm:$0xff] }
  0x73   :  { %1561 = vmatprep.subr.bf16.mxu0 %v3920_v47  ;;  %1647 = vmatprep.subr.bf16.mxu1 %v3922_v48  ;;  %v923_v46 = vld [vmem:[%s6041_s1 + $0x450] sm:$0xff]  ;;  %v922_v47 = vld [vmem:[%s6041_s1 + $0x418] sm:$0xff] }
  0x74   :  { %v924_v48 = vld [vmem:[%s6041_s1 + $0x458] sm:$0xff]  ;;  %v3952_v52 = vcombine.high %v921_v45, %v923_v46  ;;  %v3951_v59 = vcombine.low %v921_v45, %v923_v46 }
  0x75   :  { %793 = vmatmul.mubr.bf16.vlgmr.msra.gmra.mrb[0].mxu0 %v4829_v51  ;;  %879 = vmatmul.mubr.bf16.vlgmr.msra.gmra.mrb[0].mxu1 %v4829_v51  ;;  %v3954_v53 = vcombine.high %v922_v47, %v924_v48  ;;  %v3953_v60 = vcombine.low %v922_v47, %v924_v48 }
  0x76   :  { %1562 = vmatpush1.bf16.msra.mxu0 %v3919_v54  ;;  %1648 = vmatpush1.bf16.msra.mxu1 %v3921_v55  ;;  %v925_v54 = vld [vmem:[%s6041_s1 + $0x490] sm:$0xff] }
  0x77   :  { %1563 = vmatprep.subr.bf16.mxu0 %v3924_v57  ;;  %1649 = vmatprep.subr.bf16.mxu1 %v3926_v58  ;;  %v927_v55 = vld [vmem:[%s6041_s1 + $0x4d0] sm:$0xff]  ;;  %v926_v57 = vld [vmem:[%s6041_s1 + $0x498] sm:$0xff] }
  0x78   :  { %1593 = vmatprep.mubr.bf16.mxu0 %v4542_v56  ;;  %1679 = vmatprep.mubr.bf16.mxu1 %v4542_v56  ;;  %v906_v56 = vld [vmem:[%s6041_s1 + $0x218] sm:$0xff]  ;;  %v3956_v61 = vcombine.high %v925_v54, %v927_v55  ;;  %v3955_v3 = vcombine.low %v925_v54, %v927_v55 }
  0x79   :  { %v3938_v18 = vcombine.high %v906_v56, %v908_v14  ;;  %v3937_v25 = vcombine.low %v906_v56, %v908_v14  ;;  %v928_v58 = vld [vmem:[%s6041_s1 + $0x4d8] sm:$0xff] }
  0x7a   :  { %1564 = vmatpush1.bf16.msra.mxu0 %v3923_v63  ;;  %1650 = vmatpush1.bf16.msra.mxu1 %v3925_v0  ;;  %v3958_v62 = vcombine.high %v926_v57, %v928_v58  ;;  %v929_v63 = vld [vmem:[%s6041_s1 + $0x510] sm:$0xff]  ;;  %v3957_v4 = vcombine.low %v926_v57, %v928_v58 }
  0x7b   :  { %1565 = vmatprep.subr.bf16.mxu0 %v3928_v1  ;;  %1651 = vmatprep.subr.bf16.mxu1 %v3930_v2  ;;  %v931_v0 = vld [vmem:[%s6041_s1 + $0x550] sm:$0xff]  ;;  %v930_v1 = vld [vmem:[%s6041_s1 + $0x518] sm:$0xff] }
  0x7c   :  { %v932_v2 = vld [vmem:[%s6041_s1 + $0x558] sm:$0xff]  ;;  %v3960_v5 = vcombine.high %v929_v63, %v931_v0  ;;  %v3959_v12 = vcombine.low %v929_v63, %v931_v0 }
  0x7d   :  { %v3962_v6 = vcombine.high %v930_v1, %v932_v2  ;;  %v3961_v13 = vcombine.low %v930_v1, %v932_v2 }
  0x7e   :  { %1566 = vmatpush1.bf16.msra.mxu0 %v3927_v7  ;;  %1652 = vmatpush1.bf16.msra.mxu1 %v3929_v8  ;;  %v933_v7 = vld [vmem:[%s6041_s1 + $0x590] sm:$0xff] }
  0x7f   :  { %1567 = vmatprep.subr.bf16.mxu0 %v3932_v9  ;;  %1653 = vmatprep.subr.bf16.mxu1 %v3934_v11  ;;  %v935_v8 = vld [vmem:[%s6041_s1 + $0x5d0] sm:$0xff]  ;;  %v934_v9 = vld [vmem:[%s6041_s1 + $0x598] sm:$0xff] }
  0x80   :  { %v936_v11 = vld [vmem:[%s6041_s1 + $0x5d8] sm:$0xff]  ;;  %v3964_v56 = vcombine.high %v933_v7, %v935_v8  ;;  %v3963_v20 = vcombine.low %v933_v7, %v935_v8 }
  0x81   :  { %v3966_v14 = vcombine.high %v934_v9, %v936_v11  ;;  %v3965_v21 = vcombine.low %v934_v9, %v936_v11 }
  0x82   :  { %1568 = vmatpush1.bf16.msra.mxu0 %v3931_v15  ;;  %1654 = vmatpush1.bf16.msra.mxu1 %v3933_v16  ;;  %v937_v15 = vld [vmem:[%s6041_s1 + $0x610] sm:$0xff] }
  0x83   :  { %1569 = vmatprep.subr.bf16.mxu0 %v3936_v17  ;;  %1655 = vmatprep.subr.bf16.mxu1 %v3938_v18  ;;  %v939_v16 = vld [vmem:[%s6041_s1 + $0x650] sm:$0xff]  ;;  %v938_v17 = vld [vmem:[%s6041_s1 + $0x618] sm:$0xff] }
  0x84   :  { %v940_v18 = vld [vmem:[%s6041_s1 + $0x658] sm:$0xff]  ;;  %v3968_v22 = vcombine.high %v937_v15, %v939_v16  ;;  %v3967_v28 = vcombine.low %v937_v15, %v939_v16 }
  0x85   :  { %v3970_v23 = vcombine.high %v938_v17, %v940_v18  ;;  %v3969_v29 = vcombine.low %v938_v17, %v940_v18  ;;  %v969_v18 = vld [vmem:[%s6041_s1 + $0xa10] sm:$0xff] }
  0x86   :  { %1570 = vmatpush1.bf16.msra.mxu0 %v3935_v24  ;;  %1656 = vmatpush1.bf16.msra.mxu1 %v3937_v25  ;;  %v941_v24 = vld [vmem:[%s6041_s1 + $0x690] sm:$0xff] }
  0x87   :  { %1571 = vmatprep.subr.bf16.mxu0 %v3940_v26  ;;  %1657 = vmatprep.subr.bf16.mxu1 %v3942_v27  ;;  %v943_v25 = vld [vmem:[%s6041_s1 + $0x6d0] sm:$0xff]  ;;  %v942_v26 = vld [vmem:[%s6041_s1 + $0x698] sm:$0xff] }
  0x88   :  { %v944_v27 = vld [vmem:[%s6041_s1 + $0x6d8] sm:$0xff]  ;;  %v3972_v30 = vcombine.high %v941_v24, %v943_v25  ;;  %v3971_v37 = vcombine.low %v941_v24, %v943_v25 }
  0x89   :  { %v3974_v31 = vcombine.high %v942_v26, %v944_v27  ;;  %v3973_v38 = vcombine.low %v942_v26, %v944_v27  ;;  %v973_v26 = vld [vmem:[%s6041_s1 + $0xa90] sm:$0xff] }
  0x8a   :  { %1572 = vmatpush1.bf16.msra.mxu0 %v3939_v32  ;;  %1658 = vmatpush1.bf16.msra.mxu1 %v3941_v34  ;;  %v945_v32 = vld [vmem:[%s6041_s1 + $0x710] sm:$0xff] }
  0x8b   :  { %1573 = vmatprep.subr.bf16.mxu0 %v3944_v35  ;;  %1659 = vmatprep.subr.bf16.mxu1 %v3946_v36  ;;  %v947_v34 = vld [vmem:[%s6041_s1 + $0x750] sm:$0xff]  ;;  %v946_v35 = vld [vmem:[%s6041_s1 + $0x718] sm:$0xff] }
  0x8c   :  { %v948_v36 = vld [vmem:[%s6041_s1 + $0x758] sm:$0xff]  ;;  %v3976_v39 = vcombine.high %v945_v32, %v947_v34  ;;  %v3975_v45 = vcombine.low %v945_v32, %v947_v34  ;;  %v975_v27 = vld [vmem:[%s6041_s1 + $0xad0] sm:$0xff] }
  0x8d   :  { %v3978_v40 = vcombine.high %v946_v35, %v948_v36  ;;  %v3977_v46 = vcombine.low %v946_v35, %v948_v36  ;;  %v4004_v32 = vcombine.high %v973_v26, %v975_v27  ;;  %v977_v35 = vld [vmem:[%s6041_s1 + $0xb10] sm:$0xff] }
  0x8e   :  { %1574 = vmatpush1.bf16.msra.mxu0 %v3943_v41  ;;  %1660 = vmatpush1.bf16.msra.mxu1 %v3945_v42  ;;  %v949_v41 = vld [vmem:[%s6041_s1 + $0x790] sm:$0xff] }
  0x8f   :  { %1575 = vmatprep.subr.bf16.mxu0 %v3948_v43  ;;  %1661 = vmatprep.subr.bf16.mxu1 %v3950_v44  ;;  %v951_v42 = vld [vmem:[%s6041_s1 + $0x7d0] sm:$0xff]  ;;  %v950_v43 = vld [vmem:[%s6041_s1 + $0x798] sm:$0xff] }
  0x90   :  { %v952_v44 = vld [vmem:[%s6041_s1 + $0x7d8] sm:$0xff]  ;;  %v3980_v47 = vcombine.high %v949_v41, %v951_v42  ;;  %v3979_v54 = vcombine.low %v949_v41, %v951_v42  ;;  %v979_v36 = vld [vmem:[%s6041_s1 + $0xb50] sm:$0xff] }
  0x91   :  { %v3982_v48 = vcombine.high %v950_v43, %v952_v44  ;;  %v3981_v55 = vcombine.low %v950_v43, %v952_v44  ;;  %v4008_v41 = vcombine.high %v977_v35, %v979_v36  ;;  %v981_v43 = vld [vmem:[%s6041_s1 + $0xb90] sm:$0xff] }
  0x92   :  { %1576 = vmatpush1.bf16.msra.mxu0 %v3947_v49  ;;  %1662 = vmatpush1.bf16.msra.mxu1 %v3949_v50  ;;  %v953_v49 = vld [vmem:[%s6041_s1 + $0x810] sm:$0xff] }
  0x93   :  { %1577 = vmatprep.subr.bf16.mxu0 %v3952_v52  ;;  %1663 = vmatprep.subr.bf16.mxu1 %v3954_v53  ;;  %v955_v50 = vld [vmem:[%s6041_s1 + $0x850] sm:$0xff]  ;;  %v954_v52 = vld [vmem:[%s6041_s1 + $0x818] sm:$0xff] }
  0x94   :  { %v956_v53 = vld [vmem:[%s6041_s1 + $0x858] sm:$0xff]  ;;  %v3984_v57 = vcombine.high %v953_v49, %v955_v50  ;;  %v3983_v63 = vcombine.low %v953_v49, %v955_v50  ;;  %v983_v44 = vld [vmem:[%s6041_s1 + $0xbd0] sm:$0xff] }
  0x95   :  { %v3986_v58 = vcombine.high %v954_v52, %v956_v53  ;;  %v3985_v0 = vcombine.low %v954_v52, %v956_v53  ;;  %v4012_v49 = vcombine.high %v981_v43, %v983_v44  ;;  %v985_v52 = vld [vmem:[%s6041_s1 + $0xc10] sm:$0xff] }
  0x96   :  { %1578 = vmatpush1.bf16.msra.mxu0 %v3951_v59  ;;  %1664 = vmatpush1.bf16.msra.mxu1 %v3953_v60  ;;  %v957_v59 = vld [vmem:[%s6041_s1 + $0x890] sm:$0xff] }
  0x97   :  { %1579 = vmatprep.subr.bf16.mxu0 %v3956_v61  ;;  %1665 = vmatprep.subr.bf16.mxu1 %v3958_v62  ;;  %v959_v60 = vld [vmem:[%s6041_s1 + $0x8d0] sm:$0xff]  ;;  %v958_v61 = vld [vmem:[%s6041_s1 + $0x898] sm:$0xff] }
  0x98   :  { %v960_v62 = vld [vmem:[%s6041_s1 + $0x8d8] sm:$0xff]  ;;  %v3988_v1 = vcombine.high %v957_v59, %v959_v60  ;;  %v3987_v7 = vcombine.low %v957_v59, %v959_v60  ;;  %v987_v53 = vld [vmem:[%s6041_s1 + $0xc50] sm:$0xff] }
  0x99   :  { %v3990_v2 = vcombine.high %v958_v61, %v960_v62  ;;  %v3989_v8 = vcombine.low %v958_v61, %v960_v62  ;;  %v4016_v59 = vcombine.high %v985_v52, %v987_v53  ;;  %v989_v61 = vld [vmem:[%s6041_s1 + $0xc90] sm:$0xff] }
  0x9a   :  { %1580 = vmatpush1.bf16.msra.mxu0 %v3955_v3  ;;  %1666 = vmatpush1.bf16.msra.mxu1 %v3957_v4  ;;  %v961_v3 = vld [vmem:[%s6041_s1 + $0x910] sm:$0xff] }
  0x9b   :  { %1581 = vmatprep.subr.bf16.mxu0 %v3960_v5  ;;  %1667 = vmatprep.subr.bf16.mxu1 %v3962_v6  ;;  %v963_v4 = vld [vmem:[%s6041_s1 + $0x950] sm:$0xff]  ;;  %v962_v5 = vld [vmem:[%s6041_s1 + $0x918] sm:$0xff] }
  0x9c   :  { %v964_v6 = vld [vmem:[%s6041_s1 + $0x958] sm:$0xff]  ;;  %v3992_v9 = vcombine.high %v961_v3, %v963_v4  ;;  %v991_v62 = vld [vmem:[%s6041_s1 + $0xcd0] sm:$0xff] }
  0x9d   :  { %v3994_v11 = vcombine.high %v962_v5, %v964_v6  ;;  %v3993_v15 = vcombine.low %v962_v5, %v964_v6  ;;  %v993_v5 = vld [vmem:[%s6041_s1 + $0xd10] sm:$0xff] }
  0x9e   :  { %1582 = vmatpush1.bf16.msra.mxu0 %v3959_v12  ;;  %1668 = vmatpush1.bf16.msra.mxu1 %v3961_v13  ;;  %v965_v12 = vld [vmem:[%s6041_s1 + $0x990] sm:$0xff] }
  0x9f   :  { %1583 = vmatprep.subr.bf16.mxu0 %v3964_v56  ;;  %1669 = vmatprep.subr.bf16.mxu1 %v3966_v14  ;;  %v967_v13 = vld [vmem:[%s6041_s1 + $0x9d0] sm:$0xff]  ;;  %v968_v56 = vld [vmem:[%s6041_s1 + $0x9d8] sm:$0xff]  ;;  %v3991_v14 = vcombine.low %v961_v3, %v963_v4  ;;  %v4020_v3 = vcombine.high %v989_v61, %v991_v62 }
  0xa0   :  { %v3996_v16 = vcombine.high %v965_v12, %v967_v13  ;;  %v995_v6 = vld [vmem:[%s6041_s1 + $0xd50] sm:$0xff] }
  0xa2   :  { %1584 = vmatpush1.bf16.msra.mxu0 %v3963_v20  ;;  %1670 = vmatpush1.bf16.msra.mxu1 %v3965_v21  ;;  %v971_v20 = vld [vmem:[%s6041_s1 + $0xa50] sm:$0xff]  ;;  %v972_v21 = vld [vmem:[%s6041_s1 + $0xa58] sm:$0xff] }
  0xa3   :  { %1585 = vmatprep.subr.bf16.mxu0 %v3968_v22  ;;  %1671 = vmatprep.subr.bf16.mxu1 %v3970_v23  ;;  %v3995_v22 = vcombine.low %v965_v12, %v967_v13  ;;  %v4000_v24 = vcombine.high %v969_v18, %v971_v20  ;;  %v4019_v12 = vcombine.low %v989_v61, %v991_v62 }
  0xa6   :  { %1586 = vmatpush1.bf16.msra.mxu0 %v3967_v28  ;;  %1672 = vmatpush1.bf16.msra.mxu1 %v3969_v29  ;;  %v974_v28 = vld [vmem:[%s6041_s1 + $0xa98] sm:$0xff] }
  0xa7   :  { %1587 = vmatprep.subr.bf16.mxu0 %v3972_v30  ;;  %1673 = vmatprep.subr.bf16.mxu1 %v3974_v31  ;;  %v976_v29 = vld [vmem:[%s6041_s1 + $0xad8] sm:$0xff]  ;;  %v3999_v30 = vcombine.low %v969_v18, %v971_v20 }
  0xa8   :  { %v4006_v34 = vcombine.high %v974_v28, %v976_v29 }
  0xaa   :  { %1588 = vmatpush1.bf16.msra.mxu0 %v3971_v37  ;;  %1674 = vmatpush1.bf16.msra.mxu1 %v3973_v38  ;;  %v978_v37 = vld [vmem:[%s6041_s1 + $0xb18] sm:$0xff] }
  0xab   :  { %1589 = vmatprep.subr.bf16.mxu0 %v3976_v39  ;;  %1675 = vmatprep.subr.bf16.mxu1 %v3978_v40  ;;  %v980_v38 = vld [vmem:[%s6041_s1 + $0xb58] sm:$0xff]  ;;  %v4003_v39 = vcombine.low %v973_v26, %v975_v27  ;;  %v4005_v40 = vcombine.low %v974_v28, %v976_v29 }
  0xac   :  { %v4010_v42 = vcombine.high %v978_v37, %v980_v38 }
  0xae   :  { %1590 = vmatpush1.bf16.msra.mxu0 %v3975_v45  ;;  %1676 = vmatpush1.bf16.msra.mxu1 %v3977_v46  ;;  %v982_v45 = vld [vmem:[%s6041_s1 + $0xb98] sm:$0xff] }
  0xaf   :  { %1591 = vmatprep.subr.bf16.mxu0 %v3980_v47  ;;  %1677 = vmatprep.subr.bf16.mxu1 %v3982_v48  ;;  %v984_v46 = vld [vmem:[%s6041_s1 + $0xbd8] sm:$0xff]  ;;  %v4007_v47 = vcombine.low %v977_v35, %v979_v36  ;;  %v4009_v48 = vcombine.low %v978_v37, %v980_v38 }
  0xb0   :  { %v4014_v50 = vcombine.high %v982_v45, %v984_v46 }
  0xb2   :  { %1592 = vmatpush1.bf16.msra.mxu0 %v3979_v54  ;;  %1678 = vmatpush1.bf16.msra.mxu1 %v3981_v55  ;;  %v986_v54 = vld [vmem:[%s6041_s1 + $0xc18] sm:$0xff] }
  0xb3   :  { %1604 = vmatprep.subr.bf16.mxu0 %v3984_v57  ;;  %1690 = vmatprep.subr.bf16.mxu1 %v3986_v58  ;;  %v988_v55 = vld [vmem:[%s6041_s1 + $0xc58] sm:$0xff]  ;;  %v4011_v57 = vcombine.low %v981_v43, %v983_v44  ;;  %v4013_v58 = vcombine.low %v982_v45, %v984_v46 }
  0xb4   :  { %v4018_v60 = vcombine.high %v986_v54, %v988_v55 }
  0xb5   :  { %1594 = vmatmul.mubr.bf16.vlgmr.msra.gmra.mrb[4].mxu0 %v4669_v10  ;;  %1680 = vmatmul.mubr.bf16.vlgmr.msra.gmra.mrb[4].mxu1 %v4669_v10  ;;  %v966_v10 = vld [vmem:[%s6041_s1 + $0x998] sm:$0xff] }
  0xb6   :  { %1605 = vmatpush1.bf16.msra.mxu0 %v3983_v63  ;;  %1691 = vmatpush1.bf16.msra.mxu1 %v3985_v0  ;;  %v3998_v17 = vcombine.high %v966_v10, %v968_v56  ;;  %v3997_v23 = vcombine.low %v966_v10, %v968_v56  ;;  %v990_v63 = vld [vmem:[%s6041_s1 + $0xc98] sm:$0xff]  ;;  %v4024_v10 = vcombine.high %v993_v5, %v995_v6 }
  0xb7   :  { %1606 = vmatprep.subr.bf16.mxu0 %v3988_v1  ;;  %1692 = vmatprep.subr.bf16.mxu1 %v3990_v2  ;;  %v992_v0 = vld [vmem:[%s6041_s1 + $0xcd8] sm:$0xff]  ;;  %v4015_v1 = vcombine.low %v985_v52, %v987_v53  ;;  %v4017_v2 = vcombine.low %v986_v54, %v988_v55 }
  0xb8   :  { %4031 = vmatprep.mubr.msk.bf16.mxu0 %vm698_vm0, %v4686_v19  ;;  %4032 = vmatprep.mubr.msk.bf16.mxu1 %vm698_vm0, %v4686_v19  ;;  %v970_v19 = vld [vmem:[%s6041_s1 + $0xa18] sm:$0xff]  ;;  %v4022_v4 = vcombine.high %v990_v63, %v992_v0  ;;  %v4021_v13 = vcombine.low %v990_v63, %v992_v0 }
  0xb9   :  { %v4002_v25 = vcombine.high %v970_v19, %v972_v21  ;;  %v4001_v31 = vcombine.low %v970_v19, %v972_v21 }
  0xba   :  { %1607 = vmatpush1.bf16.msra.mxu0 %v3987_v7  ;;  %1693 = vmatpush1.bf16.msra.mxu1 %v3989_v8  ;;  %v997_v7 = vld [vmem:[%s6041_s1 + $0xd90] sm:$0x11]  ;;  %v994_v8 = vld [vmem:[%s6041_s1 + $0xd18] sm:$0xff] }
  0xbb   :  { %1608 = vmatprep.subr.bf16.mxu0 %v3992_v9  ;;  %1694 = vmatprep.subr.bf16.mxu1 %v3994_v11  ;;  %v996_v9 = vld [vmem:[%s6041_s1 + $0xd58] sm:$0xff]  ;;  %v4028_v56 = vcombine.high %v997_v7, %v997_v7 }
  0xbc   :  { %v998_v11 = vld [vmem:[%s6041_s1 + $0xd98] sm:$0x11]  ;;  %v4025_v18 = vcombine.low %v994_v8, %v996_v9 }
  0xbd   :  { %v1553_v20 = vand.u32 %v4028_v56, %v4802_v33  ;;  %v4029_v19 = vcombine.low %v998_v11, %v998_v11 }
  0xbe   :  { %1609 = vmatpush1.bf16.msra.mxu0 %v3991_v14  ;;  %1695 = vmatpush1.bf16.msra.mxu1 %v3993_v15  ;;  %v4026_v14 = vcombine.high %v994_v8, %v996_v9  ;;  %v4030_v15 = vcombine.high %v998_v11, %v998_v11  ;;  %v1765_v9 = vld [vmem:[%s6041_s1 + $0x320] sm:$0xff] }
  0xbf   :  { %1610 = vmatprep.subr.bf16.mxu0 %v3996_v16  ;;  %1696 = vmatprep.subr.bf16.mxu1 %v3998_v17  ;;  %v4023_v16 = vcombine.low %v993_v5, %v995_v6  ;;  %v4027_v17 = vcombine.low %v997_v7, %v997_v7  ;;  %v1556_v27 = vand.u32 %v4029_v19, %v4802_v33  ;;  %v1767_v11 = vld [vmem:[%s6041_s1 + $0x360] sm:$0xff] }
  0xc0   :  { %v1559_v21 = vand.u32 %v4030_v15, %v4802_v33  ;;  %v4057_v19 = vcombine.low %v1765_v9, %v1767_v11 }
  0xc1   :  { %v1550_v26 = vand.u32 %v4027_v17, %v4802_v33  ;;  %v1771_v17 = vld [vmem:[%s6041_s1 + $0x3e0] sm:$0xff] }
  0xc2   :  { %1611 = vmatpush1.bf16.msra.mxu0 %v3995_v22  ;;  %1697 = vmatpush1.bf16.msra.mxu1 %v3997_v23  ;;  %v1741_v22 = vld [vmem:[%s6041_s1 + $0x20] sm:$0xff] }
  0xc3   :  { %1612 = vmatprep.subr.bf16.mxu0 %v4000_v24  ;;  %1698 = vmatprep.subr.bf16.mxu1 %v4002_v25  ;;  %v1743_v23 = vld [vmem:[%s6041_s1 + $0x60] sm:$0xff]  ;;  %v1742_v24 = vld [vmem:[%s6041_s1 + $0x28] sm:$0xff] }
  0xc4   :  { %v1744_v25 = vld [vmem:[%s6041_s1 + $0x68] sm:$0xff]  ;;  %v4034_v28 = vcombine.high %v1741_v22, %v1743_v23  ;;  %v4033_v35 = vcombine.low %v1741_v22, %v1743_v23 }
  0xc5   :  { %v4036_v29 = vcombine.high %v1742_v24, %v1744_v25  ;;  %v4035_v36 = vcombine.low %v1742_v24, %v1744_v25  ;;  %v1773_v24 = vld [vmem:[%s6041_s1 + $0x420] sm:$0xff] }
  0xc6   :  { %1613 = vmatpush1.bf16.msra.mxu0 %v3999_v30  ;;  %1699 = vmatpush1.bf16.msra.mxu1 %v4001_v31  ;;  %v1745_v30 = vld [vmem:[%s6041_s1 + $0xa0] sm:$0xff] }
  0xc7   :  { %1614 = vmatprep.subr.bf16.mxu0 %v4004_v32  ;;  %1700 = vmatprep.subr.bf16.mxu1 %v4006_v34  ;;  %v1747_v31 = vld [vmem:[%s6041_s1 + $0xe0] sm:$0xff]  ;;  %v1746_v32 = vld [vmem:[%s6041_s1 + $0xa8] sm:$0xff] }
  0xc8   :  { %v1748_v34 = vld [vmem:[%s6041_s1 + $0xe8] sm:$0xff]  ;;  %v4038_v37 = vcombine.high %v1745_v30, %v1747_v31  ;;  %v4037_v43 = vcombine.low %v1745_v30, %v1747_v31  ;;  %v1775_v25 = vld [vmem:[%s6041_s1 + $0x460] sm:$0xff] }
  0xc9   :  { %v4040_v38 = vcombine.high %v1746_v32, %v1748_v34  ;;  %v4039_v44 = vcombine.low %v1746_v32, %v1748_v34  ;;  %v4066_v30 = vcombine.high %v1773_v24, %v1775_v25  ;;  %v1777_v32 = vld [vmem:[%s6041_s1 + $0x4a0] sm:$0xff] }
  0xca   :  { %1615 = vmatpush1.bf16.msra.mxu0 %v4003_v39  ;;  %1701 = vmatpush1.bf16.msra.mxu1 %v4005_v40  ;;  %v1749_v39 = vld [vmem:[%s6041_s1 + $0x120] sm:$0xff] }
  0xcb   :  { %1616 = vmatprep.subr.bf16.mxu0 %v4008_v41  ;;  %1702 = vmatprep.subr.bf16.mxu1 %v4010_v42  ;;  %v1751_v40 = vld [vmem:[%s6041_s1 + $0x160] sm:$0xff]  ;;  %v1750_v41 = vld [vmem:[%s6041_s1 + $0x128] sm:$0xff] }
  0xcc   :  { %v1752_v42 = vld [vmem:[%s6041_s1 + $0x168] sm:$0xff]  ;;  %v4042_v45 = vcombine.high %v1749_v39, %v1751_v40  ;;  %v4041_v52 = vcombine.low %v1749_v39, %v1751_v40  ;;  %v1779_v34 = vld [vmem:[%s6041_s1 + $0x4e0] sm:$0xff] }
  0xcd   :  { %v4044_v46 = vcombine.high %v1750_v41, %v1752_v42  ;;  %v4043_v53 = vcombine.low %v1750_v41, %v1752_v42  ;;  %v4070_v39 = vcombine.high %v1777_v32, %v1779_v34  ;;  %v1781_v41 = vld [vmem:[%s6041_s1 + $0x520] sm:$0xff] }
  0xce   :  { %1617 = vmatpush1.bf16.msra.mxu0 %v4007_v47  ;;  %1703 = vmatpush1.bf16.msra.mxu1 %v4009_v48  ;;  %v1753_v47 = vld [vmem:[%s6041_s1 + $0x1a0] sm:$0xff] }
  0xcf   :  { %1618 = vmatprep.subr.bf16.mxu0 %v4012_v49  ;;  %1704 = vmatprep.subr.bf16.mxu1 %v4014_v50  ;;  %v1755_v48 = vld [vmem:[%s6041_s1 + $0x1e0] sm:$0xff]  ;;  %v1754_v49 = vld [vmem:[%s6041_s1 + $0x1a8] sm:$0xff] }
  0xd0   :  { %v1756_v50 = vld [vmem:[%s6041_s1 + $0x1e8] sm:$0xff]  ;;  %v4046_v54 = vcombine.high %v1753_v47, %v1755_v48  ;;  %v4045_v61 = vcombine.low %v1753_v47, %v1755_v48  ;;  %v1783_v42 = vld [vmem:[%s6041_s1 + $0x560] sm:$0xff] }
  0xd1   :  { %v4048_v55 = vcombine.high %v1754_v49, %v1756_v50  ;;  %v4047_v62 = vcombine.low %v1754_v49, %v1756_v50  ;;  %v4074_v47 = vcombine.high %v1781_v41, %v1783_v42  ;;  %v1785_v49 = vld [vmem:[%s6041_s1 + $0x5a0] sm:$0xff] }
  0xd2   :  { %1619 = vmatpush1.bf16.msra.mxu0 %v4011_v57  ;;  %1705 = vmatpush1.bf16.msra.mxu1 %v4013_v58  ;;  %v1757_v57 = vld [vmem:[%s6041_s1 + $0x220] sm:$0xff] }
  0xd3   :  { %1620 = vmatprep.subr.bf16.mxu0 %v4016_v59  ;;  %1706 = vmatprep.subr.bf16.mxu1 %v4018_v60  ;;  %v1759_v58 = vld [vmem:[%s6041_s1 + $0x260] sm:$0xff]  ;;  %v1758_v59 = vld [vmem:[%s6041_s1 + $0x228] sm:$0xff] }
  0xd4   :  { %v1760_v60 = vld [vmem:[%s6041_s1 + $0x268] sm:$0xff]  ;;  %v4050_v63 = vcombine.high %v1757_v57, %v1759_v58  ;;  %v4049_v5 = vcombine.low %v1757_v57, %v1759_v58  ;;  %v1787_v50 = vld [vmem:[%s6041_s1 + $0x5e0] sm:$0xff] }
  0xd5   :  { %v4052_v0 = vcombine.high %v1758_v59, %v1760_v60  ;;  %v4051_v6 = vcombine.low %v1758_v59, %v1760_v60  ;;  %v4078_v57 = vcombine.high %v1785_v49, %v1787_v50  ;;  %v1789_v59 = vld [vmem:[%s6041_s1 + $0x620] sm:$0xff] }
  0xd6   :  { %1621 = vmatpush1.bf16.msra.mxu0 %v4015_v1  ;;  %1707 = vmatpush1.bf16.msra.mxu1 %v4017_v2  ;;  %v1761_v1 = vld [vmem:[%s6041_s1 + $0x2a0] sm:$0xff] }
  0xd7   :  { %1622 = vmatprep.subr.bf16.mxu0 %v4020_v3  ;;  %1708 = vmatprep.subr.bf16.mxu1 %v4022_v4  ;;  %v1763_v2 = vld [vmem:[%s6041_s1 + $0x2e0] sm:$0xff]  ;;  %v1762_v3 = vld [vmem:[%s6041_s1 + $0x2a8] sm:$0xff] }
  0xd8   :  { %v1764_v4 = vld [vmem:[%s6041_s1 + $0x2e8] sm:$0xff]  ;;  %v4054_v7 = vcombine.high %v1761_v1, %v1763_v2  ;;  %v1791_v60 = vld [vmem:[%s6041_s1 + $0x660] sm:$0xff] }
  0xd9   :  { %v4056_v8 = vcombine.high %v1762_v3, %v1764_v4  ;;  %v4055_v56 = vcombine.low %v1762_v3, %v1764_v4  ;;  %v1793_v3 = vld [vmem:[%s6041_s1 + $0x6a0] sm:$0xff] }
  0xda   :  { %1623 = vmatpush1.bf16.msra.mxu0 %v4019_v12  ;;  %1709 = vmatpush1.bf16.msra.mxu1 %v4021_v13  ;;  %v1766_v12 = vld [vmem:[%s6041_s1 + $0x328] sm:$0xff]  ;;  %v1795_v4 = vld [vmem:[%s6041_s1 + $0x6e0] sm:$0xff] }
  0xdb   :  { %1624 = vmatprep.subr.bf16.mxu0 %v4024_v10  ;;  %1710 = vmatprep.subr.bf16.mxu1 %v4026_v14  ;;  %v1768_v13 = vld [vmem:[%s6041_s1 + $0x368] sm:$0xff]  ;;  %v4053_v10 = vcombine.low %v1761_v1, %v1763_v2  ;;  %v4058_v14 = vcombine.high %v1765_v9, %v1767_v11  ;;  %v4082_v1 = vcombine.high %v1789_v59, %v1791_v60 }
  0xdc   :  { %v4060_v15 = vcombine.high %v1766_v12, %v1768_v13  ;;  %v4086_v9 = vcombine.high %v1793_v3, %v1795_v4 }
  0xde   :  { %1625 = vmatpush1.bf16.msra.mxu0 %v4023_v16  ;;  %1711 = vmatpush1.bf16.msra.mxu1 %v4025_v18  ;;  %v1769_v16 = vld [vmem:[%s6041_s1 + $0x3a0] sm:$0xff]  ;;  %v1770_v18 = vld [vmem:[%s6041_s1 + $0x3a8] sm:$0xff] }
  0xdf   :  { %1626 = vmatprep.subr.bf16.mxu0 %v1553_v20  ;;  %1712 = vmatprep.subr.bf16.mxu1 %v1559_v21  ;;  %v1772_v20 = vld [vmem:[%s6041_s1 + $0x3e8] sm:$0xff]  ;;  %v4059_v21 = vcombine.low %v1766_v12, %v1768_v13  ;;  %v4062_v22 = vcombine.high %v1769_v16, %v1771_v17  ;;  %v1797_v12 = vld [vmem:[%s6041_s1 + $0x720] sm:$0xff] }
  0xe0   :  { %v4064_v23 = vcombine.high %v1770_v18, %v1772_v20  ;;  %v1799_v13 = vld [vmem:[%s6041_s1 + $0x760] sm:$0xff] }
  0xe2   :  { %1627 = vmatpush1.bf16.msra.mxu0 %v1550_v26  ;;  %1713 = vmatpush1.bf16.msra.mxu1 %v1556_v27  ;;  %v1774_v26 = vld [vmem:[%s6041_s1 + $0x428] sm:$0xff] }
  0xe3   :  { %2413 = vmatprep.subr.bf16.mxu0 %v4034_v28  ;;  %2499 = vmatprep.subr.bf16.mxu1 %v4036_v29  ;;  %v1776_v27 = vld [vmem:[%s6041_s1 + $0x468] sm:$0xff]  ;;  %v4061_v28 = vcombine.low %v1769_v16, %v1771_v17  ;;  %v4063_v29 = vcombine.low %v1770_v18, %v1772_v20  ;;  %v4090_v16 = vcombine.high %v1797_v12, %v1799_v13  ;;  %v1801_v18 = vld [vmem:[%s6041_s1 + $0x7a0] sm:$0xff] }
  0xe4   :  { %v4068_v31 = vcombine.high %v1774_v26, %v1776_v27  ;;  %v1803_v20 = vld [vmem:[%s6041_s1 + $0x7e0] sm:$0xff] }
  0xe5   :  { %1637 = vmatmul.mubr.bf16.vlgmr.msra.gmra.mrb[4].mxu0 %v4829_v51  ;;  %1723 = vmatmul.mubr.bf16.vlgmr.msra.gmra.mrb[4].mxu1 %v4829_v51  ;;  %v5204_v51 = vld [vmem:[%s6042_s0 + $0x4] ss:$16 sps:$4 sm:$0xff]  }
  0xe6   :  { %2414 = vmatpush1.bf16.msra.mxu0 %v4033_v35  ;;  %2500 = vmatpush1.bf16.msra.mxu1 %v4035_v36  ;;  %v1778_v35 = vld [vmem:[%s6041_s1 + $0x4a8] sm:$0xff] }
  0xe7   :  { %2415 = vmatprep.subr.bf16.mxu0 %v4038_v37  ;;  %2501 = vmatprep.subr.bf16.mxu1 %v4040_v38  ;;  %v1780_v36 = vld [vmem:[%s6041_s1 + $0x4e8] sm:$0xff]  ;;  %v4065_v37 = vcombine.low %v1773_v24, %v1775_v25  ;;  %v4067_v38 = vcombine.low %v1774_v26, %v1776_v27  ;;  %v4094_v24 = vcombine.high %v1801_v18, %v1803_v20  ;;  %v1805_v26 = vld [vmem:[%s6041_s1 + $0x820] sm:$0xff] }
  0xe8   :  { %2445 = vmatprep.mubr.bf16.mxu0 %v5204_v51  ;;  %2531 = vmatprep.mubr.bf16.mxu1 %v5204_v51  ;;  %v4072_v40 = vcombine.high %v1778_v35, %v1780_v36  ;;  %v1807_v27 = vld [vmem:[%s6041_s1 + $0x860] sm:$0xff] }
  0xea   :  { %2416 = vmatpush1.bf16.msra.mxu0 %v4037_v43  ;;  %2502 = vmatpush1.bf16.msra.mxu1 %v4039_v44  ;;  %v1782_v43 = vld [vmem:[%s6041_s1 + $0x528] sm:$0xff] }
  0xeb   :  { %2417 = vmatprep.subr.bf16.mxu0 %v4042_v45  ;;  %2503 = vmatprep.subr.bf16.mxu1 %v4044_v46  ;;  %v1784_v44 = vld [vmem:[%s6041_s1 + $0x568] sm:$0xff]  ;;  %v4069_v45 = vcombine.low %v1777_v32, %v1779_v34  ;;  %v4071_v46 = vcombine.low %v1778_v35, %v1780_v36  ;;  %v4098_v32 = vcombine.high %v1805_v26, %v1807_v27  ;;  %v1809_v35 = vld [vmem:[%s6041_s1 + $0x8a0] sm:$0xff] }
  0xec   :  { %v4076_v48 = vcombine.high %v1782_v43, %v1784_v44  ;;  %v1811_v36 = vld [vmem:[%s6041_s1 + $0x8e0] sm:$0xff] }
  0xee   :  { %2418 = vmatpush1.bf16.msra.mxu0 %v4041_v52  ;;  %2504 = vmatpush1.bf16.msra.mxu1 %v4043_v53  ;;  %v1786_v52 = vld [vmem:[%s6041_s1 + $0x5a8] sm:$0xff] }
  0xef   :  { %2419 = vmatprep.subr.bf16.mxu0 %v4046_v54  ;;  %2505 = vmatprep.subr.bf16.mxu1 %v4048_v55  ;;  %v1788_v53 = vld [vmem:[%s6041_s1 + $0x5e8] sm:$0xff]  ;;  %v4073_v54 = vcombine.low %v1781_v41, %v1783_v42  ;;  %v4075_v55 = vcombine.low %v1782_v43, %v1784_v44  ;;  %v4102_v41 = vcombine.high %v1809_v35, %v1811_v36  ;;  %v1813_v43 = vld [vmem:[%s6041_s1 + $0x920] sm:$0xff] }
  0xf0   :  { %v4080_v58 = vcombine.high %v1786_v52, %v1788_v53  ;;  %v1815_v44 = vld [vmem:[%s6041_s1 + $0x960] sm:$0xff] }
  0xf2   :  { %2420 = vmatpush1.bf16.msra.mxu0 %v4045_v61  ;;  %2506 = vmatpush1.bf16.msra.mxu1 %v4047_v62  ;;  %v1790_v61 = vld [vmem:[%s6041_s1 + $0x628] sm:$0xff] }
  0xf3   :  { %2421 = vmatprep.subr.bf16.mxu0 %v4050_v63  ;;  %2507 = vmatprep.subr.bf16.mxu1 %v4052_v0  ;;  %v1792_v62 = vld [vmem:[%s6041_s1 + $0x668] sm:$0xff]  ;;  %v4077_v63 = vcombine.low %v1785_v49, %v1787_v50  ;;  %v4079_v0 = vcombine.low %v1786_v52, %v1788_v53  ;;  %v4106_v50 = vcombine.high %v1813_v43, %v1815_v44  ;;  %v1817_v53 = vld [vmem:[%s6041_s1 + $0x9a0] sm:$0xff] }
  0xf4   :  { %v4084_v2 = vcombine.high %v1790_v61, %v1792_v62 }
  0xf6   :  { %2422 = vmatpush1.bf16.msra.mxu0 %v4049_v5  ;;  %2508 = vmatpush1.bf16.msra.mxu1 %v4051_v6  ;;  %v1794_v5 = vld [vmem:[%s6041_s1 + $0x6a8] sm:$0xff] }
  0xf7   :  { %2423 = vmatprep.subr.bf16.mxu0 %v4054_v7  ;;  %2509 = vmatprep.subr.bf16.mxu1 %v4056_v8  ;;  %v1796_v6 = vld [vmem:[%s6041_s1 + $0x6e8] sm:$0xff]  ;;  %v4081_v7 = vcombine.low %v1789_v59, %v1791_v60  ;;  %v4083_v8 = vcombine.low %v1790_v61, %v1792_v62  ;;  %v4105_v59 = vcombine.low %v1813_v43, %v1815_v44 }
  0xf8   :  { %v4088_v11 = vcombine.high %v1794_v5, %v1796_v6 }
  0xfa   :  { %2424 = vmatpush1.bf16.msra.mxu0 %v4053_v10  ;;  %2510 = vmatpush1.bf16.msra.mxu1 %v4055_v56  ;;  %v1798_v10 = vld [vmem:[%s6041_s1 + $0x728] sm:$0xff] }
  0xfb   :  { %2425 = vmatprep.subr.bf16.mxu0 %v4058_v14  ;;  %2511 = vmatprep.subr.bf16.mxu1 %v4060_v15  ;;  %v1800_v56 = vld [vmem:[%s6041_s1 + $0x768] sm:$0xff]  ;;  %v4085_v14 = vcombine.low %v1793_v3, %v1795_v4  ;;  %v4087_v15 = vcombine.low %v1794_v5, %v1796_v6 }
  0xfc   :  { %v4092_v17 = vcombine.high %v1798_v10, %v1800_v56 }
  0xfe   :  { %2426 = vmatpush1.bf16.msra.mxu0 %v4057_v19  ;;  %2512 = vmatpush1.bf16.msra.mxu1 %v4059_v21  ;;  %v1802_v19 = vld [vmem:[%s6041_s1 + $0x7a8] sm:$0xff] }
  0xff   :  { %2427 = vmatprep.subr.bf16.mxu0 %v4062_v22  ;;  %2513 = vmatprep.subr.bf16.mxu1 %v4064_v23  ;;  %v1804_v21 = vld [vmem:[%s6041_s1 + $0x7e8] sm:$0xff]  ;;  %v4089_v22 = vcombine.low %v1797_v12, %v1799_v13  ;;  %v4091_v23 = vcombine.low %v1798_v10, %v1800_v56 }
 0x100   :  { %v4096_v25 = vcombine.high %v1802_v19, %v1804_v21 }
 0x102   :  { %2428 = vmatpush1.bf16.msra.mxu0 %v4061_v28  ;;  %2514 = vmatpush1.bf16.msra.mxu1 %v4063_v29  ;;  %v1806_v28 = vld [vmem:[%s6041_s1 + $0x828] sm:$0xff] }
 0x103   :  { %2429 = vmatprep.subr.bf16.mxu0 %v4066_v30  ;;  %2515 = vmatprep.subr.bf16.mxu1 %v4068_v31  ;;  %v1808_v29 = vld [vmem:[%s6041_s1 + $0x868] sm:$0xff]  ;;  %v4093_v30 = vcombine.low %v1801_v18, %v1803_v20  ;;  %v4095_v31 = vcombine.low %v1802_v19, %v1804_v21 }
 0x104   :  { %v4100_v34 = vcombine.high %v1806_v28, %v1808_v29 }
 0x106   :  { %2430 = vmatpush1.bf16.msra.mxu0 %v4065_v37  ;;  %2516 = vmatpush1.bf16.msra.mxu1 %v4067_v38  ;;  %v1810_v37 = vld [vmem:[%s6041_s1 + $0x8a8] sm:$0xff] }
 0x107   :  { %2431 = vmatprep.subr.bf16.mxu0 %v4070_v39  ;;  %2517 = vmatprep.subr.bf16.mxu1 %v4072_v40  ;;  %v1812_v38 = vld [vmem:[%s6041_s1 + $0x8e8] sm:$0xff]  ;;  %v4097_v39 = vcombine.low %v1805_v26, %v1807_v27  ;;  %v4099_v40 = vcombine.low %v1806_v28, %v1808_v29 }
 0x108   :  { %v4104_v42 = vcombine.high %v1810_v37, %v1812_v38  ;;  %v4103_v49 = vcombine.low %v1810_v37, %v1812_v38 }
 0x10a   :  { %2432 = vmatpush1.bf16.msra.mxu0 %v4069_v45  ;;  %2518 = vmatpush1.bf16.msra.mxu1 %v4071_v46  ;;  %v5391_v45 = vld [vmem:[%s6042_s0] ss:$16 sps:$4 sm:$0xff]   ;;  %v1814_v46 = vld [vmem:[%s6041_s1 + $0x928] sm:$0xff] }
 0x10b   :  { %2433 = vmatprep.subr.bf16.mxu0 %v4074_v47  ;;  %2519 = vmatprep.subr.bf16.mxu1 %v4076_v48  ;;  %v1816_v47 = vld [vmem:[%s6041_s1 + $0x968] sm:$0xff]  ;;  %v4101_v48 = vcombine.low %v1809_v35, %v1811_v36 }
 0x10c   :  { %v4108_v52 = vcombine.high %v1814_v46, %v1816_v47  ;;  %v4107_v60 = vcombine.low %v1814_v46, %v1816_v47 }
 0x10e   :  { %2434 = vmatpush1.bf16.msra.mxu0 %v4073_v54  ;;  %2520 = vmatpush1.bf16.msra.mxu1 %v4075_v55  ;;  %v1819_v54 = vld [vmem:[%s6041_s1 + $0x9e0] sm:$0xff]  ;;  %v5410_v55 = vld [vmem:[%s6042_s0 + $0xc] ss:$16 sps:$4 sm:$0xff]  }
 0x10f   :  { %2435 = vmatprep.subr.bf16.mxu0 %v4078_v57  ;;  %2521 = vmatprep.subr.bf16.mxu1 %v4080_v58  ;;  %v1818_v57 = vld [vmem:[%s6041_s1 + $0x9a8] sm:$0xff]  ;;  %v4110_v61 = vcombine.high %v1817_v53, %v1819_v54  ;;  %v4109_v3 = vcombine.low %v1817_v53, %v1819_v54 }
 0x110   :  { %v1820_v58 = vld [vmem:[%s6041_s1 + $0x9e8] sm:$0xff] }
 0x111   :  { %v4112_v62 = vcombine.high %v1818_v57, %v1820_v58  ;;  %v4111_v4 = vcombine.low %v1818_v57, %v1820_v58  ;;  %v1848_v53 = vld [vmem:[%s6041_s1 + $0xd68] sm:$0xff] }
 0x112   :  { %2436 = vmatpush1.bf16.msra.mxu0 %v4077_v63  ;;  %2522 = vmatpush1.bf16.msra.mxu1 %v4079_v0  ;;  %v1821_v63 = vld [vmem:[%s6041_s1 + $0xa20] sm:$0xff]  ;;  %v1850_v54 = vld [vmem:[%s6041_s1 + $0xda8] sm:$0x11] }
 0x113   :  { %2437 = vmatprep.subr.bf16.mxu0 %v4082_v1  ;;  %2523 = vmatprep.subr.bf16.mxu1 %v4084_v2  ;;  %v1823_v0 = vld [vmem:[%s6041_s1 + $0xa60] sm:$0xff]  ;;  %v1822_v1 = vld [vmem:[%s6041_s1 + $0xa28] sm:$0xff] }
 0x114   :  { %v1824_v2 = vld [vmem:[%s6041_s1 + $0xa68] sm:$0xff]  ;;  %v4114_v5 = vcombine.high %v1821_v63, %v1823_v0  ;;  %v4113_v12 = vcombine.low %v1821_v63, %v1823_v0  ;;  %v4144_v63 = vcombine.high %v1850_v54, %v1850_v54 }
 0x115   :  { %v4116_v6 = vcombine.high %v1822_v1, %v1824_v2  ;;  %v4115_v13 = vcombine.low %v1822_v1, %v1824_v2 }
 0x116   :  { %2438 = vmatpush1.bf16.msra.mxu0 %v4081_v7  ;;  %2524 = vmatpush1.bf16.msra.mxu1 %v4083_v8  ;;  %v1825_v7 = vld [vmem:[%s6041_s1 + $0xaa0] sm:$0xff] }
 0x117   :  { %2439 = vmatprep.subr.bf16.mxu0 %v4086_v9  ;;  %2525 = vmatprep.subr.bf16.mxu1 %v4088_v11  ;;  %v1827_v8 = vld [vmem:[%s6041_s1 + $0xae0] sm:$0xff]  ;;  %v1826_v9 = vld [vmem:[%s6041_s1 + $0xaa8] sm:$0xff] }
 0x118   :  { %v1828_v11 = vld [vmem:[%s6041_s1 + $0xae8] sm:$0xff]  ;;  %v4118_v10 = vcombine.high %v1825_v7, %v1827_v8  ;;  %v4117_v18 = vcombine.low %v1825_v7, %v1827_v8 }
 0x119   :  { %v4120_v56 = vcombine.high %v1826_v9, %v1828_v11  ;;  %v4119_v20 = vcombine.low %v1826_v9, %v1828_v11  ;;  %v4143_v11 = vcombine.low %v1850_v54, %v1850_v54 }
 0x11a   :  { %2440 = vmatpush1.bf16.msra.mxu0 %v4085_v14  ;;  %2526 = vmatpush1.bf16.msra.mxu1 %v4087_v15  ;;  %v1829_v14 = vld [vmem:[%s6041_s1 + $0xb20] sm:$0xff] }
 0x11b   :  { %2441 = vmatprep.subr.bf16.mxu0 %v4090_v16  ;;  %2527 = vmatprep.subr.bf16.mxu1 %v4092_v17  ;;  %v1831_v15 = vld [vmem:[%s6041_s1 + $0xb60] sm:$0xff]  ;;  %v1830_v16 = vld [vmem:[%s6041_s1 + $0xb28] sm:$0xff] }
 0x11c   :  { %v1832_v17 = vld [vmem:[%s6041_s1 + $0xb68] sm:$0xff]  ;;  %v4122_v19 = vcombine.high %v1829_v14, %v1831_v15  ;;  %v4121_v26 = vcombine.low %v1829_v14, %v1831_v15  ;;  %v2594_v14 = vld [vmem:[%s6041_s1 + $0x38] sm:$0xff] }
 0x11d   :  { %v4124_v21 = vcombine.high %v1830_v16, %v1832_v17  ;;  %v4123_v27 = vcombine.low %v1830_v16, %v1832_v17  ;;  %v2596_v15 = vld [vmem:[%s6041_s1 + $0x78] sm:$0xff]  ;;  %v2408_v17 = vand.u32 %v4143_v11, %v4802_v33 }
 0x11e   :  { %2442 = vmatpush1.bf16.msra.mxu0 %v4089_v22  ;;  %2528 = vmatpush1.bf16.msra.mxu1 %v4091_v23  ;;  %v1833_v22 = vld [vmem:[%s6041_s1 + $0xba0] sm:$0xff]  ;;  %v2618_v11 = vld [vmem:[%s6041_s1 + $0x338] sm:$0xff] }
 0x11f   :  { %2443 = vmatprep.subr.bf16.mxu0 %v4094_v24  ;;  %2529 = vmatprep.subr.bf16.mxu1 %v4096_v25  ;;  %v1835_v23 = vld [vmem:[%s6041_s1 + $0xbe0] sm:$0xff]  ;;  %v1834_v24 = vld [vmem:[%s6041_s1 + $0xba8] sm:$0xff] }
 0x120   :  { %v1836_v25 = vld [vmem:[%s6041_s1 + $0xbe8] sm:$0xff]  ;;  %v4126_v28 = vcombine.high %v1833_v22, %v1835_v23  ;;  %v4125_v35 = vcombine.low %v1833_v22, %v1835_v23  ;;  %v2598_v22 = vld [vmem:[%s6041_s1 + $0xb8] sm:$0xff] }
 0x121   :  { %v4128_v29 = vcombine.high %v1834_v24, %v1836_v25  ;;  %v4127_v36 = vcombine.low %v1834_v24, %v1836_v25  ;;  %v2600_v23 = vld [vmem:[%s6041_s1 + $0xf8] sm:$0xff]  ;;  %v4149_v25 = vcombine.low %v2594_v14, %v2596_v15 }
 0x122   :  { %2444 = vmatpush1.bf16.msra.mxu0 %v4093_v30  ;;  %2530 = vmatpush1.bf16.msra.mxu1 %v4095_v31  ;;  %v1837_v30 = vld [vmem:[%s6041_s1 + $0xc20] sm:$0xff] }
 0x123   :  { %2456 = vmatprep.subr.bf16.mxu0 %v4098_v32  ;;  %2542 = vmatprep.subr.bf16.mxu1 %v4100_v34  ;;  %v1839_v31 = vld [vmem:[%s6041_s1 + $0xc60] sm:$0xff]  ;;  %v1838_v32 = vld [vmem:[%s6041_s1 + $0xc28] sm:$0xff] }
 0x124   :  { %v1840_v34 = vld [vmem:[%s6041_s1 + $0xc68] sm:$0xff]  ;;  %v4130_v37 = vcombine.high %v1837_v30, %v1839_v31  ;;  %v4129_v43 = vcombine.low %v1837_v30, %v1839_v31  ;;  %v2602_v31 = vld [vmem:[%s6041_s1 + $0x138] sm:$0xff] }
 0x125   :  { %2446 = vmatmul.mubr.bf16.vlgmr.msra.gmra.mrb[8].mxu0 %v5391_v45  ;;  %2532 = vmatmul.mubr.bf16.vlgmr.msra.gmra.mrb[8].mxu1 %v5391_v45  ;;  %v4132_v38 = vcombine.high %v1838_v32, %v1840_v34  ;;  %v4131_v44 = vcombine.low %v1838_v32, %v1840_v34  ;;  %v5565_v30 = vld [vmem:[%s6042_s0 + $0x8] ss:$16 sps:$4 sm:$0xff]  }
 0x126   :  { %2457 = vmatpush1.bf16.msra.mxu0 %v4097_v39  ;;  %2543 = vmatpush1.bf16.msra.mxu1 %v4099_v40  ;;  %v1841_v39 = vld [vmem:[%s6041_s1 + $0xca0] sm:$0xff]  ;;  %v2604_v32 = vld [vmem:[%s6041_s1 + $0x178] sm:$0xff] }
 0x127   :  { %2458 = vmatprep.subr.bf16.mxu0 %v4102_v41  ;;  %2544 = vmatprep.subr.bf16.mxu1 %v4104_v42  ;;  %v1843_v40 = vld [vmem:[%s6041_s1 + $0xce0] sm:$0xff]  ;;  %v1842_v41 = vld [vmem:[%s6041_s1 + $0xca8] sm:$0xff] }
 0x128   :  { %4145 = vmatprep.mubr.msk.bf16.mxu0 %vm698_vm0, %v5410_v55  ;;  %4146 = vmatprep.mubr.msk.bf16.mxu1 %vm698_vm0, %v5410_v55  ;;  %v1844_v42 = vld [vmem:[%s6041_s1 + $0xce8] sm:$0xff]  ;;  %v4134_v46 = vcombine.high %v1841_v39, %v1843_v40  ;;  %v4133_v57 = vcombine.low %v1841_v39, %v1843_v40  ;;  %v2607_v39 = vld [vmem:[%s6041_s1 + $0x1f0] sm:$0xff]  ;;  %v2606_v40 = vld [vmem:[%s6041_s1 + $0x1b8] sm:$0xff] }
 0x129   :  { %v4136_v47 = vcombine.high %v1842_v41, %v1844_v42  ;;  %v4135_v58 = vcombine.low %v1842_v41, %v1844_v42  ;;  %v2608_v41 = vld [vmem:[%s6041_s1 + $0x1f8] sm:$0xff] }
 0x12a   :  { %2459 = vmatpush1.bf16.msra.mxu0 %v4101_v48  ;;  %2545 = vmatpush1.bf16.msra.mxu1 %v4103_v49  ;;  %v1845_v48 = vld [vmem:[%s6041_s1 + $0xd20] sm:$0xff] }
 0x12b   :  { %2460 = vmatprep.subr.bf16.mxu0 %v4106_v50  ;;  %2546 = vmatprep.subr.bf16.mxu1 %v4108_v52  ;;  %v1847_v49 = vld [vmem:[%s6041_s1 + $0xd60] sm:$0xff]  ;;  %v1846_v52 = vld [vmem:[%s6041_s1 + $0xd28] sm:$0xff] }
 0x12c   :  { %v1849_v50 = vld [vmem:[%s6041_s1 + $0xda0] sm:$0x11]  ;;  %v4139_v8 = vcombine.low %v1846_v52, %v1848_v53 }
 0x12e   :  { %2461 = vmatpush1.bf16.msra.mxu0 %v4105_v59  ;;  %2547 = vmatpush1.bf16.msra.mxu1 %v4107_v60  ;;  %v4138_v59 = vcombine.high %v1845_v48, %v1847_v49  ;;  %v4142_v60 = vcombine.high %v1849_v50, %v1849_v50 }
 0x12f   :  { %2462 = vmatprep.subr.bf16.mxu0 %v4110_v61  ;;  %2548 = vmatprep.subr.bf16.mxu1 %v4112_v62  ;;  %v4140_v62 = vcombine.high %v1846_v52, %v1848_v53  ;;  %v4161_v52 = vcombine.low %v2606_v40, %v2608_v41 }
 0x130   :  { %v2405_v9 = vand.u32 %v4142_v60, %v4802_v33  ;;  %v2616_v60 = vld [vmem:[%s6041_s1 + $0x2f8] sm:$0xff] }
 0x132   :  { %2463 = vmatpush1.bf16.msra.mxu0 %v4109_v3  ;;  %2549 = vmatpush1.bf16.msra.mxu1 %v4111_v4  ;;  %v4137_v4 = vcombine.low %v1845_v48, %v1847_v49  ;;  %v2611_v48 = vld [vmem:[%s6041_s1 + $0x270] sm:$0xff]  ;;  %v2612_v49 = vld [vmem:[%s6041_s1 + $0x278] sm:$0xff] }
 0x133   :  { %2464 = vmatprep.subr.bf16.mxu0 %v4114_v5  ;;  %2550 = vmatprep.subr.bf16.mxu1 %v4116_v6  ;;  %v4141_v5 = vcombine.low %v1849_v50, %v1849_v50 }
 0x135   :  { %v2402_v16 = vand.u32 %v4141_v5, %v4802_v33 }
 0x136   :  { %2465 = vmatpush1.bf16.msra.mxu0 %v4113_v12  ;;  %2551 = vmatpush1.bf16.msra.mxu1 %v4115_v13  ;;  %v2411_v13 = vand.u32 %v4144_v63, %v4802_v33 }
 0x137   :  { %2466 = vmatprep.subr.bf16.mxu0 %v4118_v10  ;;  %2552 = vmatprep.subr.bf16.mxu1 %v4120_v56  ;;  %v2593_v10 = vld [vmem:[%s6041_s1 + $0x30] sm:$0xff] }
 0x138   :  { %v2595_v56 = vld [vmem:[%s6041_s1 + $0x70] sm:$0xff] }
 0x139   :  { %v4147_v24 = vcombine.low %v2593_v10, %v2595_v56 }
 0x13a   :  { %2467 = vmatpush1.bf16.msra.mxu0 %v4117_v18  ;;  %2553 = vmatpush1.bf16.msra.mxu1 %v4119_v20  ;;  %v4148_v18 = vcombine.high %v2593_v10, %v2595_v56  ;;  %v4150_v20 = vcombine.high %v2594_v14, %v2596_v15 }
 0x13b   :  { %2468 = vmatprep.subr.bf16.mxu0 %v4122_v19  ;;  %2554 = vmatprep.subr.bf16.mxu1 %v4124_v21  ;;  %v2597_v19 = vld [vmem:[%s6041_s1 + $0xb0] sm:$0xff] }
 0x13c   :  { %v2599_v21 = vld [vmem:[%s6041_s1 + $0xf0] sm:$0xff] }
 0x13d   :  { %v4151_v34 = vcombine.low %v2597_v19, %v2599_v21 }
 0x13e   :  { %2469 = vmatpush1.bf16.msra.mxu0 %v4121_v26  ;;  %2555 = vmatpush1.bf16.msra.mxu1 %v4123_v27  ;;  %v4152_v26 = vcombine.high %v2597_v19, %v2599_v21  ;;  %v4154_v27 = vcombine.high %v2598_v22, %v2600_v23 }
 0x13f   :  { %2470 = vmatprep.subr.bf16.mxu0 %v4126_v28  ;;  %2556 = vmatprep.subr.bf16.mxu1 %v4128_v29  ;;  %v2601_v28 = vld [vmem:[%s6041_s1 + $0x130] sm:$0xff] }
 0x140   :  { %v2603_v29 = vld [vmem:[%s6041_s1 + $0x170] sm:$0xff] }
 0x141   :  { %v4155_v42 = vcombine.low %v2601_v28, %v2603_v29 }
 0x142   :  { %2471 = vmatpush1.bf16.msra.mxu0 %v4125_v35  ;;  %2557 = vmatpush1.bf16.msra.mxu1 %v4127_v36  ;;  %v4153_v35 = vcombine.low %v2598_v22, %v2600_v23  ;;  %v4156_v36 = vcombine.high %v2601_v28, %v2603_v29 }
 0x143   :  { %2472 = vmatprep.subr.bf16.mxu0 %v4130_v37  ;;  %2558 = vmatprep.subr.bf16.mxu1 %v4132_v38  ;;  %v4158_v37 = vcombine.high %v2602_v31, %v2604_v32  ;;  %v2605_v38 = vld [vmem:[%s6041_s1 + $0x1b0] sm:$0xff] }
 0x144   :  { %v4159_v50 = vcombine.low %v2605_v38, %v2607_v39 }
 0x146   :  { %2473 = vmatpush1.bf16.msra.mxu0 %v4129_v43  ;;  %2559 = vmatpush1.bf16.msra.mxu1 %v4131_v44  ;;  %v4157_v43 = vcombine.low %v2602_v31, %v2604_v32  ;;  %v4160_v44 = vcombine.high %v2605_v38, %v2607_v39 }
 0x147   :  { %2474 = vmatprep.subr.bf16.mxu0 %v4134_v46  ;;  %2560 = vmatprep.subr.bf16.mxu1 %v4136_v47  ;;  %v4162_v46 = vcombine.high %v2606_v40, %v2608_v41  ;;  %v2609_v47 = vld [vmem:[%s6041_s1 + $0x230] sm:$0xff] }
 0x148   :  { %v5512_v61 = vpop.f32.mrb[0].mxu0  ;;  %v5514_v0 = vpop.f32.mrb[0].mxu1  ;;  %v4164_v53 = vcombine.high %v2609_v47, %v2611_v48 }
 0x149   :  { %v5516_v1 = vpop.f32.mrb[1].mxu0  ;;  %v5518_v2 = vpop.f32.mrb[1].mxu1 }
 0x14a   :  { %v5520_v3 = vpop.f32.mrb[2].mxu0  ;;  %2475 = vmatpush1.bf16.msra.mxu0 %v4133_v57  ;;  %v5522_v6 = vpop.f32.mrb[2].mxu1  ;;  %2561 = vmatpush1.bf16.msra.mxu1 %v4135_v58  ;;  %v2613_v57 = vld [vmem:[%s6041_s1 + $0x2b0] sm:$0xff] }
 0x14b   :  { %v5524_v7 = vpop.f32.mrb[3].mxu0  ;;  %2476 = vmatprep.subr.bf16.mxu0 %v4138_v59  ;;  %v5527_v12 = vpop.f32.mrb[3].mxu1  ;;  %2562 = vmatprep.subr.bf16.mxu1 %v4140_v62  ;;  %v2615_v58 = vld [vmem:[%s6041_s1 + $0x2f0] sm:$0xff]  ;;  %v2614_v59 = vld [vmem:[%s6041_s1 + $0x2b8] sm:$0xff]  ;;  %v4163_v62 = vcombine.low %v2609_v47, %v2611_v48 }
 0x14c   :  { %v4170_v5 = vcombine.high %v2614_v59, %v2616_v60  ;;  %v4167_v10 = vcombine.low %v2613_v57, %v2615_v58  ;;  %v4169_v56 = vcombine.low %v2614_v59, %v2616_v60 }
 0x14e   :  { %2477 = vmatpush1.bf16.msra.mxu0 %v4137_v4  ;;  %2563 = vmatpush1.bf16.msra.mxu1 %v4139_v8  ;;  %v4168_v4 = vcombine.high %v2613_v57, %v2615_v58  ;;  %v2617_v8 = vld [vmem:[%s6041_s1 + $0x330] sm:$0xff] }
 0x14f   :  { %2478 = vmatprep.subr.bf16.mxu0 %v2405_v9  ;;  %2564 = vmatprep.subr.bf16.mxu1 %v2411_v13  ;;  %v2619_v9 = vld [vmem:[%s6041_s1 + $0x370] sm:$0xff]  ;;  %v2620_v13 = vld [vmem:[%s6041_s1 + $0x378] sm:$0xff] }
 0x150   :  { %v4172_v14 = vcombine.high %v2617_v8, %v2619_v9  ;;  %v4174_v15 = vcombine.high %v2618_v11, %v2620_v13  ;;  %v4171_v19 = vcombine.low %v2617_v8, %v2619_v9  ;;  %v4173_v21 = vcombine.low %v2618_v11, %v2620_v13 }
 0x152   :  { %2479 = vmatpush1.bf16.msra.mxu0 %v2402_v16  ;;  %2565 = vmatpush1.bf16.msra.mxu1 %v2408_v17  ;;  %v2621_v16 = vld [vmem:[%s6041_s1 + $0x3b0] sm:$0xff] }
 0x153   :  { %3265 = vmatprep.subr.bf16.mxu0 %v4148_v18  ;;  %3351 = vmatprep.subr.bf16.mxu1 %v4150_v20  ;;  %v2623_v17 = vld [vmem:[%s6041_s1 + $0x3f0] sm:$0xff]  ;;  %v2622_v18 = vld [vmem:[%s6041_s1 + $0x3b8] sm:$0xff] }
 0x154   :  { %v2624_v20 = vld [vmem:[%s6041_s1 + $0x3f8] sm:$0xff]  ;;  %v4176_v22 = vcombine.high %v2621_v16, %v2623_v17  ;;  %v4175_v28 = vcombine.low %v2621_v16, %v2623_v17 }
 0x155   :  { %2489 = vmatmul.mubr.bf16.vlgmr.msra.gmra.mrb[8].mxu0 %v5565_v30  ;;  %2575 = vmatmul.mubr.bf16.vlgmr.msra.gmra.mrb[8].mxu1 %v5565_v30  ;;  %v4178_v23 = vcombine.high %v2622_v18, %v2624_v20  ;;  %v4177_v29 = vcombine.low %v2622_v18, %v2624_v20 }
 0x156   :  { %3266 = vmatpush1.bf16.msra.mxu0 %v4147_v24  ;;  %3352 = vmatpush1.bf16.msra.mxu1 %v4149_v25  ;;  %v2625_v24 = vld [vmem:[%s6041_s1 + $0x430] sm:$0xff] }
 0x157   :  { %3267 = vmatprep.subr.bf16.mxu0 %v4152_v26  ;;  %3353 = vmatprep.subr.bf16.mxu1 %v4154_v27  ;;  %v2627_v25 = vld [vmem:[%s6041_s1 + $0x470] sm:$0xff]  ;;  %v2626_v26 = vld [vmem:[%s6041_s1 + $0x438] sm:$0xff] }
 0x158   :  { %3297 = vmatprep.mubr.bf16.mxu0 %v5204_v51  ;;  %3383 = vmatprep.mubr.bf16.mxu1 %v5204_v51  ;;  %v2610_v51 = vld [vmem:[%s6041_s1 + $0x238] sm:$0xff]  ;;  %v4180_v31 = vcombine.high %v2625_v24, %v2627_v25  ;;  %v4179_v38 = vcombine.low %v2625_v24, %v2627_v25 }
 0x159   :  { %v4166_v54 = vcombine.high %v2610_v51, %v2612_v49  ;;  %v4165_v63 = vcombine.low %v2610_v51, %v2612_v49  ;;  %v2628_v27 = vld [vmem:[%s6041_s1 + $0x478] sm:$0xff] }
 0x15a   :  { %3268 = vmatpush1.bf16.msra.mxu0 %v4151_v34  ;;  %3354 = vmatpush1.bf16.msra.mxu1 %v4153_v35  ;;  %v4182_v32 = vcombine.high %v2626_v26, %v2628_v27  ;;  %v2629_v34 = vld [vmem:[%s6041_s1 + $0x4b0] sm:$0xff]  ;;  %v4181_v39 = vcombine.low %v2626_v26, %v2628_v27 }
 0x15b   :  { %3269 = vmatprep.subr.bf16.mxu0 %v4156_v36  ;;  %3355 = vmatprep.subr.bf16.mxu1 %v4158_v37  ;;  %v2631_v35 = vld [vmem:[%s6041_s1 + $0x4f0] sm:$0xff]  ;;  %v2630_v36 = vld [vmem:[%s6041_s1 + $0x4b8] sm:$0xff] }
 0x15c   :  { %v2632_v37 = vld [vmem:[%s6041_s1 + $0x4f8] sm:$0xff]  ;;  %v4184_v40 = vcombine.high %v2629_v34, %v2631_v35  ;;  %v4183_v47 = vcombine.low %v2629_v34, %v2631_v35 }
 0x15d   :  { %v4186_v41 = vcombine.high %v2630_v36, %v2632_v37  ;;  %v4185_v48 = vcombine.low %v2630_v36, %v2632_v37 }
 0x15e   :  { %3270 = vmatpush1.bf16.msra.mxu0 %v4155_v42  ;;  %3356 = vmatpush1.bf16.msra.mxu1 %v4157_v43  ;;  %v2633_v42 = vld [vmem:[%s6041_s1 + $0x530] sm:$0xff] }
 0x15f   :  { %3271 = vmatprep.subr.bf16.mxu0 %v4160_v44  ;;  %3357 = vmatprep.subr.bf16.mxu1 %v4162_v46  ;;  %v2635_v43 = vld [vmem:[%s6041_s1 + $0x570] sm:$0xff]  ;;  %v2634_v44 = vld [vmem:[%s6041_s1 + $0x538] sm:$0xff] }
 0x160   :  { %v2636_v46 = vld [vmem:[%s6041_s1 + $0x578] sm:$0xff]  ;;  %v4188_v51 = vcombine.high %v2633_v42, %v2635_v43  ;;  %v4187_v57 = vcombine.low %v2633_v42, %v2635_v43 }
 0x161   :  { %v4190_v49 = vcombine.high %v2634_v44, %v2636_v46  ;;  %v4189_v58 = vcombine.low %v2634_v44, %v2636_v46 }
 0x162   :  { %3272 = vmatpush1.bf16.msra.mxu0 %v4159_v50  ;;  %3358 = vmatpush1.bf16.msra.mxu1 %v4161_v52  ;;  %v2637_v50 = vld [vmem:[%s6041_s1 + $0x5b0] sm:$0xff] }
 0x163   :  { %3273 = vmatprep.subr.bf16.mxu0 %v4164_v53  ;;  %3359 = vmatprep.subr.bf16.mxu1 %v4166_v54  ;;  %v2639_v52 = vld [vmem:[%s6041_s1 + $0x5f0] sm:$0xff]  ;;  %v2638_v53 = vld [vmem:[%s6041_s1 + $0x5b8] sm:$0xff] }
 0x164   :  { %v2640_v54 = vld [vmem:[%s6041_s1 + $0x5f8] sm:$0xff]  ;;  %v4192_v59 = vcombine.high %v2637_v50, %v2639_v52  ;;  %v4191_v8 = vcombine.low %v2637_v50, %v2639_v52 }
 0x165   :  { %v4194_v60 = vcombine.high %v2638_v53, %v2640_v54  ;;  %v4193_v9 = vcombine.low %v2638_v53, %v2640_v54 }
 0x166   :  { %3274 = vmatpush1.bf16.msra.mxu0 %v4163_v62  ;;  %3360 = vmatpush1.bf16.msra.mxu1 %v4165_v63  ;;  %v2641_v62 = vld [vmem:[%s6041_s1 + $0x630] sm:$0xff] }
 0x167   :  { %3275 = vmatprep.subr.bf16.mxu0 %v4168_v4  ;;  %3361 = vmatprep.subr.bf16.mxu1 %v4170_v5  ;;  %v2643_v63 = vld [vmem:[%s6041_s1 + $0x670] sm:$0xff]  ;;  %v2642_v4 = vld [vmem:[%s6041_s1 + $0x638] sm:$0xff] }
 0x168   :  { %v2644_v5 = vld [vmem:[%s6041_s1 + $0x678] sm:$0xff]  ;;  %v4196_v11 = vcombine.high %v2641_v62, %v2643_v63  ;;  %v4195_v16 = vcombine.low %v2641_v62, %v2643_v63 }
 0x169   :  { %v4198_v13 = vcombine.high %v2642_v4, %v2644_v5  ;;  %v4197_v17 = vcombine.low %v2642_v4, %v2644_v5 }
 0x16a   :  { %3276 = vmatpush1.bf16.msra.mxu0 %v4167_v10  ;;  %3362 = vmatpush1.bf16.msra.mxu1 %v4169_v56  ;;  %v2645_v10 = vld [vmem:[%s6041_s1 + $0x6b0] sm:$0xff] }
 0x16b   :  { %3277 = vmatprep.subr.bf16.mxu0 %v4172_v14  ;;  %3363 = vmatprep.subr.bf16.mxu1 %v4174_v15  ;;  %v2647_v56 = vld [vmem:[%s6041_s1 + $0x6f0] sm:$0xff]  ;;  %v2646_v14 = vld [vmem:[%s6041_s1 + $0x6b8] sm:$0xff] }
 0x16c   :  { %v2648_v15 = vld [vmem:[%s6041_s1 + $0x6f8] sm:$0xff]  ;;  %v4200_v18 = vcombine.high %v2645_v10, %v2647_v56  ;;  %v4199_v24 = vcombine.low %v2645_v10, %v2647_v56 }
 0x16d   :  { %v4202_v20 = vcombine.high %v2646_v14, %v2648_v15  ;;  %v4201_v25 = vcombine.low %v2646_v14, %v2648_v15  ;;  %v2673_v15 = vld [vmem:[%s6041_s1 + $0xa30] sm:$0xff] }
 0x16e   :  { %3278 = vmatpush1.bf16.msra.mxu0 %v4171_v19  ;;  %3364 = vmatpush1.bf16.msra.mxu1 %v4173_v21  ;;  %v2649_v19 = vld [vmem:[%s6041_s1 + $0x730] sm:$0xff] }
 0x16f   :  { %3279 = vmatprep.subr.bf16.mxu0 %v4176_v22  ;;  %3365 = vmatprep.subr.bf16.mxu1 %v4178_v23  ;;  %v2651_v21 = vld [vmem:[%s6041_s1 + $0x770] sm:$0xff]  ;;  %v2650_v22 = vld [vmem:[%s6041_s1 + $0x738] sm:$0xff] }
 0x170   :  { %v2652_v23 = vld [vmem:[%s6041_s1 + $0x778] sm:$0xff]  ;;  %v4204_v26 = vcombine.high %v2649_v19, %v2651_v21  ;;  %v4203_v34 = vcombine.low %v2649_v19, %v2651_v21 }
 0x171   :  { %v4206_v27 = vcombine.high %v2650_v22, %v2652_v23  ;;  %v4205_v35 = vcombine.low %v2650_v22, %v2652_v23  ;;  %v2677_v22 = vld [vmem:[%s6041_s1 + $0xab0] sm:$0xff] }
 0x172   :  { %3280 = vmatpush1.bf16.msra.mxu0 %v4175_v28  ;;  %3366 = vmatpush1.bf16.msra.mxu1 %v4177_v29  ;;  %v2653_v28 = vld [vmem:[%s6041_s1 + $0x7b0] sm:$0xff] }
 0x173   :  { %3281 = vmatprep.subr.bf16.mxu0 %v4180_v31  ;;  %3367 = vmatprep.subr.bf16.mxu1 %v4182_v32  ;;  %v2655_v29 = vld [vmem:[%s6041_s1 + $0x7f0] sm:$0xff]  ;;  %v2654_v31 = vld [vmem:[%s6041_s1 + $0x7b8] sm:$0xff] }
 0x174   :  { %v2656_v32 = vld [vmem:[%s6041_s1 + $0x7f8] sm:$0xff]  ;;  %v4208_v36 = vcombine.high %v2653_v28, %v2655_v29  ;;  %v4207_v42 = vcombine.low %v2653_v28, %v2655_v29  ;;  %v2679_v23 = vld [vmem:[%s6041_s1 + $0xaf0] sm:$0xff] }
 0x175   :  { %v4210_v37 = vcombine.high %v2654_v31, %v2656_v32  ;;  %v4209_v43 = vcombine.low %v2654_v31, %v2656_v32  ;;  %v4232_v28 = vcombine.high %v2677_v22, %v2679_v23  ;;  %v2681_v31 = vld [vmem:[%s6041_s1 + $0xb30] sm:$0xff] }
 0x176   :  { %3282 = vmatpush1.bf16.msra.mxu0 %v4179_v38  ;;  %3368 = vmatpush1.bf16.msra.mxu1 %v4181_v39  ;;  %v2657_v38 = vld [vmem:[%s6041_s1 + $0x830] sm:$0xff] }
 0x177   :  { %3283 = vmatprep.subr.bf16.mxu0 %v4184_v40  ;;  %3369 = vmatprep.subr.bf16.mxu1 %v4186_v41  ;;  %v2659_v39 = vld [vmem:[%s6041_s1 + $0x870] sm:$0xff]  ;;  %v2658_v40 = vld [vmem:[%s6041_s1 + $0x838] sm:$0xff] }
 0x178   :  { %v2660_v41 = vld [vmem:[%s6041_s1 + $0x878] sm:$0xff]  ;;  %v4212_v44 = vcombine.high %v2657_v38, %v2659_v39  ;;  %v4211_v50 = vcombine.low %v2657_v38, %v2659_v39  ;;  %v2683_v32 = vld [vmem:[%s6041_s1 + $0xb70] sm:$0xff] }
 0x179   :  { %v4214_v46 = vcombine.high %v2658_v40, %v2660_v41  ;;  %v4213_v52 = vcombine.low %v2658_v40, %v2660_v41  ;;  %v4236_v38 = vcombine.high %v2681_v31, %v2683_v32  ;;  %v2685_v40 = vld [vmem:[%s6041_s1 + $0xbb0] sm:$0xff] }
 0x17a   :  { %3284 = vmatpush1.bf16.msra.mxu0 %v4183_v47  ;;  %3370 = vmatpush1.bf16.msra.mxu1 %v4185_v48  ;;  %v2661_v47 = vld [vmem:[%s6041_s1 + $0x8b0] sm:$0xff] }
 0x17b   :  { %3285 = vmatprep.subr.bf16.mxu0 %v4188_v51  ;;  %3371 = vmatprep.subr.bf16.mxu1 %v4190_v49  ;;  %v2663_v48 = vld [vmem:[%s6041_s1 + $0x8f0] sm:$0xff]  ;;  %v2662_v51 = vld [vmem:[%s6041_s1 + $0x8b8] sm:$0xff] }
 0x17c   :  { %v2664_v49 = vld [vmem:[%s6041_s1 + $0x8f8] sm:$0xff]  ;;  %v4216_v53 = vcombine.high %v2661_v47, %v2663_v48  ;;  %v4215_v62 = vcombine.low %v2661_v47, %v2663_v48  ;;  %v2687_v41 = vld [vmem:[%s6041_s1 + $0xbf0] sm:$0xff] }
 0x17d   :  { %v4218_v54 = vcombine.high %v2662_v51, %v2664_v49  ;;  %v4217_v63 = vcombine.low %v2662_v51, %v2664_v49  ;;  %v4240_v47 = vcombine.high %v2685_v40, %v2687_v41  ;;  %v2689_v51 = vld [vmem:[%s6041_s1 + $0xc30] sm:$0xff] }
 0x17e   :  { %3286 = vmatpush1.bf16.msra.mxu0 %v4187_v57  ;;  %3372 = vmatpush1.bf16.msra.mxu1 %v4189_v58  ;;  %v2665_v57 = vld [vmem:[%s6041_s1 + $0x930] sm:$0xff] }
 0x17f   :  { %3287 = vmatprep.subr.bf16.mxu0 %v4192_v59  ;;  %3373 = vmatprep.subr.bf16.mxu1 %v4194_v60  ;;  %v2667_v58 = vld [vmem:[%s6041_s1 + $0x970] sm:$0xff]  ;;  %v2666_v59 = vld [vmem:[%s6041_s1 + $0x938] sm:$0xff] }
 0x180   :  { %v2668_v60 = vld [vmem:[%s6041_s1 + $0x978] sm:$0xff]  ;;  %v4220_v4 = vcombine.high %v2665_v57, %v2667_v58  ;;  %v2691_v49 = vld [vmem:[%s6041_s1 + $0xc70] sm:$0xff] }
 0x181   :  { %v4222_v5 = vcombine.high %v2666_v59, %v2668_v60  ;;  %v4221_v10 = vcombine.low %v2666_v59, %v2668_v60  ;;  %v2695_v59 = vld [vmem:[%s6041_s1 + $0xcf0] sm:$0xff] }
 0x182   :  { %3288 = vmatpush1.bf16.msra.mxu0 %v4191_v8  ;;  %3374 = vmatpush1.bf16.msra.mxu1 %v4193_v9  ;;  %v2669_v8 = vld [vmem:[%s6041_s1 + $0x9b0] sm:$0xff] }
 0x183   :  { %3289 = vmatprep.subr.bf16.mxu0 %v4196_v11  ;;  %3375 = vmatprep.subr.bf16.mxu1 %v4198_v13  ;;  %v2671_v9 = vld [vmem:[%s6041_s1 + $0x9f0] sm:$0xff]  ;;  %v2672_v11 = vld [vmem:[%s6041_s1 + $0x9f8] sm:$0xff]  ;;  %v4219_v13 = vcombine.low %v2665_v57, %v2667_v58  ;;  %v4244_v58 = vcombine.high %v2689_v51, %v2691_v49 }
 0x184   :  { %v4224_v56 = vcombine.high %v2669_v8, %v2671_v9 }
 0x186   :  { %3290 = vmatpush1.bf16.msra.mxu0 %v4195_v16  ;;  %3376 = vmatpush1.bf16.msra.mxu1 %v4197_v17  ;;  %v2675_v16 = vld [vmem:[%s6041_s1 + $0xa70] sm:$0xff]  ;;  %v2676_v17 = vld [vmem:[%s6041_s1 + $0xa78] sm:$0xff] }
 0x187   :  { %3291 = vmatprep.subr.bf16.mxu0 %v4200_v18  ;;  %3377 = vmatprep.subr.bf16.mxu1 %v4202_v20  ;;  %v4223_v18 = vcombine.low %v2669_v8, %v2671_v9  ;;  %v4228_v19 = vcombine.high %v2673_v15, %v2675_v16  ;;  %v2699_v8 = vld [vmem:[%s6041_s1 + $0xd70] sm:$0xff] }
 0x18a   :  { %3292 = vmatpush1.bf16.msra.mxu0 %v4199_v24  ;;  %3378 = vmatpush1.bf16.msra.mxu1 %v4201_v25  ;;  %v2678_v24 = vld [vmem:[%s6041_s1 + $0xab8] sm:$0xff] }
 0x18b   :  { %3293 = vmatprep.subr.bf16.mxu0 %v4204_v26  ;;  %3379 = vmatprep.subr.bf16.mxu1 %v4206_v27  ;;  %v2680_v25 = vld [vmem:[%s6041_s1 + $0xaf8] sm:$0xff]  ;;  %v4227_v26 = vcombine.low %v2673_v15, %v2675_v16 }
 0x18c   :  { %v4234_v29 = vcombine.high %v2678_v24, %v2680_v25 }
 0x18e   :  { %3294 = vmatpush1.bf16.msra.mxu0 %v4203_v34  ;;  %3380 = vmatpush1.bf16.msra.mxu1 %v4205_v35  ;;  %v2682_v34 = vld [vmem:[%s6041_s1 + $0xb38] sm:$0xff] }
 0x18f   :  { %3295 = vmatprep.subr.bf16.mxu0 %v4208_v36  ;;  %3381 = vmatprep.subr.bf16.mxu1 %v4210_v37  ;;  %v2684_v35 = vld [vmem:[%s6041_s1 + $0xb78] sm:$0xff]  ;;  %v4231_v36 = vcombine.low %v2677_v22, %v2679_v23  ;;  %v4233_v37 = vcombine.low %v2678_v24, %v2680_v25 }
 0x190   :  { %v4238_v39 = vcombine.high %v2682_v34, %v2684_v35 }
 0x192   :  { %3296 = vmatpush1.bf16.msra.mxu0 %v4207_v42  ;;  %3382 = vmatpush1.bf16.msra.mxu1 %v4209_v43  ;;  %v2686_v42 = vld [vmem:[%s6041_s1 + $0xbb8] sm:$0xff] }
 0x193   :  { %3308 = vmatprep.subr.bf16.mxu0 %v4212_v44  ;;  %3394 = vmatprep.subr.bf16.mxu1 %v4214_v46  ;;  %v2688_v43 = vld [vmem:[%s6041_s1 + $0xbf8] sm:$0xff]  ;;  %v4235_v44 = vcombine.low %v2681_v31, %v2683_v32  ;;  %v4237_v46 = vcombine.low %v2682_v34, %v2684_v35 }
 0x194   :  { %v4242_v48 = vcombine.high %v2686_v42, %v2688_v43  ;;  %v4241_v57 = vcombine.low %v2686_v42, %v2688_v43 }
 0x195   :  { %3298 = vmatmul.mubr.bf16.vlgmr.msra.gmra.mrb[12].mxu0 %v5391_v45  ;;  %3384 = vmatmul.mubr.bf16.vlgmr.msra.gmra.mrb[12].mxu1 %v5391_v45  ;;  %v2670_v45 = vld [vmem:[%s6041_s1 + $0x9b8] sm:$0xff] }
 0x196   :  { %3309 = vmatpush1.bf16.msra.mxu0 %v4211_v50  ;;  %3395 = vmatpush1.bf16.msra.mxu1 %v4213_v52  ;;  %v4226_v14 = vcombine.high %v2670_v45, %v2672_v11  ;;  %v4225_v20 = vcombine.low %v2670_v45, %v2672_v11  ;;  %v2690_v50 = vld [vmem:[%s6041_s1 + $0xc38] sm:$0xff] }
 0x197   :  { %3310 = vmatprep.subr.bf16.mxu0 %v4216_v53  ;;  %3396 = vmatprep.subr.bf16.mxu1 %v4218_v54  ;;  %v2692_v52 = vld [vmem:[%s6041_s1 + $0xc78] sm:$0xff]  ;;  %v4239_v53 = vcombine.low %v2685_v40, %v2687_v41  ;;  %v2693_v54 = vld [vmem:[%s6041_s1 + $0xcb0] sm:$0xff] }
 0x198   :  { %4259 = vmatprep.mubr.msk.bf16.mxu0 %vm698_vm0, %v5410_v55  ;;  %4260 = vmatprep.mubr.msk.bf16.mxu1 %vm698_vm0, %v5410_v55  ;;  %v2674_v55 = vld [vmem:[%s6041_s1 + $0xa38] sm:$0xff]  ;;  %v4246_v60 = vcombine.high %v2690_v50, %v2692_v52  ;;  %v4245_v9 = vcombine.low %v2690_v50, %v2692_v52  ;;  %v4248_v45 = vcombine.high %v2693_v54, %v2695_v59  ;;  %v4396_v50 = vld [vmem:[%s6043_s2 + $0x48] sm:$0xff]  }
 0x199   :  { %v4230_v21 = vcombine.high %v2674_v55, %v2676_v17  ;;  %v4229_v27 = vcombine.low %v2674_v55, %v2676_v17  ;;  %v2698_v11 = vld [vmem:[%s6041_s1 + $0xd38] sm:$0xff]  ;;  %v4247_v15 = vcombine.low %v2693_v54, %v2695_v59  ;;  %v4398_v52 = vld [vmem:[%s6043_s2 + $0x8] sm:$0xff]   ;;  %v4400_v54 = vld [vmem:[%s6043_s2 + $0x50] sm:$0xff]  }
 0x19a   :  { %3311 = vmatpush1.bf16.msra.mxu0 %v4215_v62  ;;  %3397 = vmatpush1.bf16.msra.mxu1 %v4217_v63  ;;  %v2694_v62 = vld [vmem:[%s6041_s1 + $0xcb8] sm:$0xff]  ;;  %v4403_v59 = vld [vmem:[%s6043_s2 + $0x90] sm:$0xff]  }
 0x19b   :  { %3312 = vmatprep.subr.bf16.mxu0 %v4220_v4  ;;  %3398 = vmatprep.subr.bf16.mxu1 %v4222_v5  ;;  %v2696_v63 = vld [vmem:[%s6041_s1 + $0xcf8] sm:$0xff]  ;;  %v4243_v4 = vcombine.low %v2689_v51, %v2691_v49  ;;  %v2697_v5 = vld [vmem:[%s6041_s1 + $0xd30] sm:$0xff]  ;;  %v4394_v51 = vld [vmem:[%s6043_s2] sm:$0xff]  }
 0x19c   :  { %v4249_v16 = vcombine.low %v2694_v62, %v2696_v63  ;;  %v4252_v55 = vcombine.high %v2697_v5, %v2699_v8  ;;  %v4251_v24 = vcombine.low %v2697_v5, %v2699_v8  ;;  %v4395_v49 = vld [vmem:[%s6043_s2 + $0x80] sm:$0xff]  }
 0x19d   :  { %v4409_v5 = vld [vmem:[%s6043_s2 + $0xe0] sm:$0xff]  }
 0x19e   :  { %3313 = vmatpush1.bf16.msra.mxu0 %v4219_v13  ;;  %3399 = vmatpush1.bf16.msra.mxu1 %v4221_v10  ;;  %v2700_v13 = vld [vmem:[%s6041_s1 + $0xd78] sm:$0xff]  ;;  %v4250_v10 = vcombine.high %v2694_v62, %v2696_v63  ;;  %v4410_v8 = vld [vmem:[%s6043_s2 + $0x20] sm:$0xff]  }
 0x19f   :  { %3314 = vmatprep.subr.bf16.mxu0 %v4224_v56  ;;  %3400 = vmatprep.subr.bf16.mxu1 %v4226_v14  ;;  %v2701_v56 = vld [vmem:[%s6041_s1 + $0xdb0] sm:$0x11]  ;;  %v2702_v14 = vld [vmem:[%s6041_s1 + $0xdb8] sm:$0x11]  ;;  %v4253_v25 = vcombine.low %v2698_v11, %v2700_v13 }
 0x1a0   :  { %v4256_v17 = vcombine.high %v2701_v56, %v2701_v56  ;;  %v4255_v31 = vcombine.low %v2701_v56, %v2701_v56  ;;  %v4257_v32 = vcombine.low %v2702_v14, %v2702_v14  ;;  %v4406_v62 = vld [vmem:[%s6043_s2 + $0x18] sm:$0xff]   ;;  %v4416_v56 = vld [vmem:[%s6043_s2 + $0x70] sm:$0xff]  }
 0x1a1   :  { %v4407_v63 = vld [vmem:[%s6043_s2 + $0x98] sm:$0xff]  }
 0x1a2   :  { %3315 = vmatpush1.bf16.msra.mxu0 %v4223_v18  ;;  %3401 = vmatpush1.bf16.msra.mxu1 %v4225_v20  ;;  %v4254_v20 = vcombine.high %v2698_v11, %v2700_v13  ;;  %v4413_v11 = vld [vmem:[%s6043_s2 + $0xe8] sm:$0xff]  }
 0x1a3   :  { %3316 = vmatprep.subr.bf16.mxu0 %v4228_v19  ;;  %3402 = vmatprep.subr.bf16.mxu1 %v4230_v21  ;;  %v4258_v19 = vcombine.high %v2702_v14, %v2702_v14  ;;  %v4414_v13 = vld [vmem:[%s6043_s2 + $0x28] sm:$0xff]   ;;  %v4417_v14 = vld [vmem:[%s6043_s2 + $0xf0] sm:$0xff]  }
 0x1a5   :  { %v3263_v42 = vand.u32 %v4258_v19, %v4802_v33  ;;  %v4423_v19 = vld [vmem:[%s6043_s2 + $0xb8] sm:$0xff]  }
 0x1a6   :  { %3317 = vmatpush1.bf16.msra.mxu0 %v4227_v26  ;;  %3403 = vmatpush1.bf16.msra.mxu1 %v4229_v27 }
 0x1a7   :  { %3318 = vmatprep.subr.bf16.mxu0 %v4232_v28  ;;  %3404 = vmatprep.subr.bf16.mxu1 %v4234_v29 }
 0x1aa   :  { %3319 = vmatpush1.bf16.msra.mxu0 %v4231_v36  ;;  %3405 = vmatpush1.bf16.msra.mxu1 %v4233_v37 }
 0x1ab   :  { %3320 = vmatprep.subr.bf16.mxu0 %v4236_v38  ;;  %3406 = vmatprep.subr.bf16.mxu1 %v4238_v39  ;;  %v3257_v38 = vand.u32 %v4256_v17, %v4802_v33  ;;  %v4421_v17 = vld [vmem:[%s6043_s2 + $0xf8] sm:$0xff]  }
 0x1ae   :  { %3321 = vmatpush1.bf16.msra.mxu0 %v4235_v44  ;;  %3407 = vmatpush1.bf16.msra.mxu1 %v4237_v46  ;;  %v3254_v44 = vand.u32 %v4255_v31, %v4802_v33  ;;  %v4392_v46 = vld [vmem:[%s6043_s2 + $0x40] sm:$0xff]  }
 0x1af   :  { %3322 = vmatprep.subr.bf16.mxu0 %v4240_v47  ;;  %3408 = vmatprep.subr.bf16.mxu1 %v4242_v48  ;;  %v3260_v47 = vand.u32 %v4257_v32, %v4802_v33  ;;  %v4393_v48 = vld [vmem:[%s6043_s2 + $0xc0] sm:$0xff]   ;;  %v4397_v33 = vld [vmem:[%s6043_s2 + $0xc8] sm:$0xff]  }
 0x1b2   :  { %3323 = vmatpush1.bf16.msra.mxu0 %v4239_v53  ;;  %3409 = vmatpush1.bf16.msra.mxu1 %v4241_v57  ;;  %v4399_v53 = vld [vmem:[%s6043_s2 + $0x88] sm:$0xff]   ;;  %v4401_v57 = vld [vmem:[%s6043_s2 + $0xd0] sm:$0xff]  }
 0x1b3   :  { %3324 = vmatprep.subr.bf16.mxu0 %v4244_v58  ;;  %3410 = vmatprep.subr.bf16.mxu1 %v4246_v60  ;;  %v4402_v58 = vld [vmem:[%s6043_s2 + $0x10] sm:$0xff]   ;;  %v4405_v60 = vld [vmem:[%s6043_s2 + $0xd8] sm:$0xff]  }
 0x1b6   :  { %3325 = vmatpush1.bf16.msra.mxu0 %v4243_v4  ;;  %3411 = vmatpush1.bf16.msra.mxu1 %v4245_v9  ;;  %v4408_v4 = vld [vmem:[%s6043_s2 + $0x60] sm:$0xff]  }
 0x1b7   :  { %3326 = vmatprep.subr.bf16.mxu0 %v4248_v45  ;;  %3412 = vmatprep.subr.bf16.mxu1 %v4250_v10  ;;  %v4411_v9 = vld [vmem:[%s6043_s2 + $0xa0] sm:$0xff]   ;;  %v4412_v45 = vld [vmem:[%s6043_s2 + $0x68] sm:$0xff]  }
 0x1b8   :  { %v5877_v18 = vpop.f32.mrb[4].mxu0  ;;  %v5881_v22 = vpop.f32.mrb[4].mxu1  ;;  %v4415_v10 = vld [vmem:[%s6043_s2 + $0xa8] sm:$0xff]  }
 0x1b9   :  { %v1733_v21 = vmax.f32 %v5512_v61, %v5877_v18  ;;  %v5883_v23 = vpop.f32.mrb[5].mxu0  ;;  %v1735_v26 = vmax.f32 %v5514_v0, %v5881_v22  ;;  %v5889_v28 = vpop.f32.mrb[5].mxu1 }
 0x1ba   :  { %v1734_v27 = vmax.f32 %v5516_v1, %v5883_v23  ;;  %v5891_v29 = vpop.f32.mrb[6].mxu0  ;;  %3327 = vmatpush1.bf16.msra.mxu0 %v4247_v15  ;;  %v1736_v34 = vmax.f32 %v5518_v2, %v5889_v28  ;;  %v5897_v36 = vpop.f32.mrb[6].mxu1  ;;  %3413 = vmatpush1.bf16.msra.mxu1 %v4249_v16  ;;  %v4418_v15 = vld [vmem:[%s6043_s2 + $0x30] sm:$0xff]  }
 0x1bb   :  { %v1737_v35 = vmax.f32 %v5520_v3, %v5891_v29  ;;  %v5899_v37 = vpop.f32.mrb[7].mxu0  ;;  %3328 = vmatprep.subr.bf16.mxu0 %v4252_v55  ;;  %v1739_v39 = vmax.f32 %v5522_v6, %v5897_v36  ;;  %v5906_v41 = vpop.f32.mrb[7].mxu1  ;;  %3414 = vmatprep.subr.bf16.mxu1 %v4254_v20  ;;  %v4419_v16 = vld [vmem:[%s6043_s2 + $0xb0] sm:$0xff]   ;;  %v4420_v55 = vld [vmem:[%s6043_s2 + $0x78] sm:$0xff]  }
 0x1bc   :  { %v1738_v40 = vmax.f32 %v5524_v7, %v5899_v37  ;;  %v1740_v43 = vmax.f32 %v5527_v12, %v5906_v41  ;;  %v4422_v20 = vld [vmem:[%s6043_s2 + $0x38] sm:$0xff]  }
 0x1be   :  { %3329 = vmatpush1.bf16.msra.mxu0 %v4251_v24  ;;  %3415 = vmatpush1.bf16.msra.mxu1 %v4253_v25 }
 0x1bf   :  { %3330 = vmatprep.subr.bf16.mxu0 %v3257_v38  ;;  %3416 = vmatprep.subr.bf16.mxu1 %v3263_v42 }
 0x1c2   :  { %3331 = vmatpush1.bf16.msra.mxu0 %v3254_v44  ;;  %3417 = vmatpush1.bf16.msra.mxu1 %v3260_v47 }
 0x1c3   :  { %4293 = vmatprep.subr.bf16.mxu0 %v4392_v46  ;;  %4315 = vmatprep.subr.bf16.mxu1 %v4393_v48 }
 0x1c5   :  { %3341 = vmatmul.mubr.bf16.vlgmr.msra.gmra.mrb[12].mxu0 %v5565_v30  ;;  %3427 = vmatmul.mubr.bf16.vlgmr.msra.gmra.mrb[12].mxu1 %v5565_v30  ;;  %v4404_v30 = vld [vmem:[%s6043_s2 + $0x58] sm:$0xff]  }
 0x1c6   :  { %4294 = vmatpush3.bf16.msra.mxu0 %v4394_v51  ;;  %4316 = vmatpush3.bf16.msra.mxu1 %v4395_v49 }
 0x1c7   :  { %4295 = vmatprep.subr.bf16.mxu0 %v4396_v50  ;;  %4317 = vmatprep.subr.bf16.mxu1 %v4397_v33 }
 0x1ca   :  { %4296 = vmatpush3.bf16.msra.mxu0 %v4398_v52  ;;  %4318 = vmatpush3.bf16.msra.mxu1 %v4399_v53 }
 0x1cb   :  { %4297 = vmatprep.subr.bf16.mxu0 %v4400_v54  ;;  %4319 = vmatprep.subr.bf16.mxu1 %v4401_v57 }
 0x1ce   :  { %4298 = vmatpush3.bf16.msra.mxu0 %v4402_v58  ;;  %4320 = vmatpush3.bf16.msra.mxu1 %v4403_v59 }
 0x1cf   :  { %4299 = vmatprep.subr.bf16.mxu0 %v4404_v30  ;;  %4321 = vmatprep.subr.bf16.mxu1 %v4405_v60 }
 0x1d2   :  { %4300 = vmatpush3.bf16.msra.mxu0 %v4406_v62  ;;  %4322 = vmatpush3.bf16.msra.mxu1 %v4407_v63 }
 0x1d3   :  { %4301 = vmatprep.subr.bf16.mxu0 %v4408_v4  ;;  %4323 = vmatprep.subr.bf16.mxu1 %v4409_v5 }
 0x1d6   :  { %4302 = vmatpush3.bf16.msra.mxu0 %v4410_v8  ;;  %4324 = vmatpush3.bf16.msra.mxu1 %v4411_v9 }
 0x1d7   :  { %4303 = vmatprep.subr.bf16.mxu0 %v4412_v45  ;;  %4325 = vmatprep.subr.bf16.mxu1 %v4413_v11 }
 0x1da   :  { %4304 = vmatpush3.bf16.msra.mxu0 %v4414_v13  ;;  %4326 = vmatpush3.bf16.msra.mxu1 %v4415_v10 }
 0x1db   :  { %4305 = vmatprep.subr.bf16.mxu0 %v4416_v56  ;;  %4327 = vmatprep.subr.bf16.mxu1 %v4417_v14 }
 0x1de   :  { %4306 = vmatpush3.bf16.msra.mxu0 %v4418_v15  ;;  %4328 = vmatpush3.bf16.msra.mxu1 %v4419_v16 }
 0x1df   :  { %4307 = vmatprep.subr.bf16.mxu0 %v4420_v55  ;;  %4329 = vmatprep.subr.bf16.mxu1 %v4421_v17 }
 0x1e2   :  { %4308 = vmatpush3.bf16.msra.mxu0 %v4422_v20  ;;  %4330 = vmatpush3.bf16.msra.mxu1 %v4423_v19 }
 0x228   :  { %v2490_v24 = vpop.f32.mrb[8].mxu0  ;;  %v2576_v31 = vpop.f32.mrb[8].mxu1 }
 0x229   :  { %v2585_v25 = vmax.f32 %v1733_v21, %v2490_v24  ;;  %v2492_v32 = vpop.f32.mrb[9].mxu0  ;;  %v2587_v38 = vmax.f32 %v1735_v26, %v2576_v31  ;;  %v2578_v44 = vpop.f32.mrb[9].mxu1 }
 0x22a   :  { %v2586_v42 = vmax.f32 %v1734_v27, %v2492_v32  ;;  %v2494_v46 = vpop.f32.mrb[10].mxu0  ;;  %v2588_v47 = vmax.f32 %v1736_v34, %v2578_v44  ;;  %v2580_v18 = vpop.f32.mrb[10].mxu1 }
 0x22b   :  { %v2589_v61 = vmax.f32 %v1737_v35, %v2494_v46  ;;  %v2496_v21 = vpop.f32.mrb[11].mxu0  ;;  %v2591_v0 = vmax.f32 %v1739_v39, %v2580_v18  ;;  %v2582_v22 = vpop.f32.mrb[11].mxu1 }
 0x22c   :  { %v2590_v1 = vmax.f32 %v1738_v40, %v2496_v21  ;;  %v2592_v2 = vmax.f32 %v1740_v43, %v2582_v22 }
 0x298   :  { %v3342_v23 = vpop.f32.mrb[12].mxu0  ;;  %v3428_v27 = vpop.f32.mrb[12].mxu1 }
 0x299   :  { %v3437_v26 = vmax.f32 %v2585_v25, %v3342_v23  ;;  %v3344_v3 = vpop.f32.mrb[13].mxu0  ;;  %v3439_v28 = vmax.f32 %v2587_v38, %v3428_v27  ;;  %v3430_v34 = vpop.f32.mrb[13].mxu1 }
 0x29a   :  { %v3438_v29 = vmax.f32 %v2586_v42, %v3344_v3  ;;  %v3346_v35 = vpop.f32.mrb[14].mxu0  ;;  %v3440_v48 = vmax.f32 %v2588_v47, %v3430_v34  ;;  %v3432_v36 = vpop.f32.mrb[14].mxu1 }
 0x29b   :  { %v3441_v6 = vmax.f32 %v2589_v61, %v3346_v35  ;;  %v3348_v39 = vpop.f32.mrb[15].mxu0  ;;  %v3443_v51 = vmax.f32 %v2591_v0, %v3432_v36  ;;  %v3434_v37 = vpop.f32.mrb[15].mxu1  ;;  %v3445_v40 = vmax.f32 %v3437_v26, 0.0  ;;  %v3447_v12 = vmax.f32 %v3439_v28, 0.0 }
 0x29c   :  { %v3442_v7 = vmax.f32 %v2590_v1, %v3348_v39  ;;  %v3444_v50 = vmax.f32 %v2592_v2, %v3434_v37  ;;  %v3446_v41 = vmax.f32 %v3438_v29, 0.0  ;;  %v3448_v52 = vmax.f32 %v3440_v48, 0.0 }
 0x29d   :  { %v3449_v49 = vmax.f32 %v3441_v6, 0.0  ;;  %v3451_v43 = vmax.f32 %v3443_v51, 0.0 }
 0x29e   :  { %v3450_v33 = vmax.f32 %v3442_v7, 0.0  ;;  %v3452_v54 = vmax.f32 %v3444_v50, 0.0 }
 0x29f   :  { %v3453_v53 = vpack.c.bf16 %v3449_v49, %v3445_v40  ;;  %v3455_v57 = vpack.c.bf16 %v3451_v43, %v3447_v12 }
 0x2a0   :  { %v3454_v58 = vpack.c.bf16 %v3450_v33, %v3446_v41  ;;  %v3456_v59 = vpack.c.bf16 %v3452_v54, %v3448_v52 }
 0x2a2   :  { %3745 = vmatprep.mubr.bf16.mxu0 %v3454_v58  ;;  %3786 = vmatprep.mubr.bf16.mxu1 %v3456_v59 }
 0x2a3   :  { %3746 = vmatmul.mubr.bf16.vlgmr.msra.gmra.mrb[16].mxu0 %v3453_v53  ;;  %3787 = vmatmul.mubr.bf16.vlgmr.msra.gmra.mrb[16].mxu1 %v3455_v57 }
 0x376   :  { %v4309_v30 = vpop.f32.mrb[16].mxu0  ;;  %v4331_v60 = vpop.f32.mrb[16].mxu1 }
 0x377   :  { %v4310_v62 = vpop.f32.mrb[17].mxu0  ;;  %v4332_v4 = vpop.f32.mrb[17].mxu1 }
 0x378   :  { %v4311_v63 = vadd.f32 %v4310_v62, %v4309_v30  ;;  %v4312_v5 = vpop.f32.mrb[18].mxu0  ;;  %v4333_v8 = vadd.f32 %v4332_v4, %v4331_v60  ;;  %v4334_v9 = vpop.f32.mrb[18].mxu1 }
 0x379   :  { %v4313_v45 = vpop.f32.mrb[19].mxu0  ;;  %v4335_v13 = vpop.f32.mrb[19].mxu1 }
 0x37a   :  { %v4314_v11 = vadd.f32 %v4313_v45, %v4312_v5  ;;  %v3789_v10 = vadd.f32 %v4333_v8, %v4311_v63  ;;  %v4336_v56 = vadd.f32 %v4335_v13, %v4334_v9 }
 0x37c   :  { %3795 = vst [vmem:[%s6044_s3] sm:$0xff] %v3789_v10  ;;  %v3792_v14 = vadd.f32 %v4336_v56, %v4314_v11 }
 0x37e   :  { %3796 = vst [vmem:[%s6044_s3 + $0x8] sm:$0xff] %v3792_v14 }

</bundles_post_ra>
